<compile_context>
chip_gen: v6e
topology: v6e:2x2x1
jax: 0.10.0
libtpu: 0.0.40
codegen_flags: <defaults>
</compile_context>

<pallas_src>
import functools

import jax
import jax.numpy as jnp
from jax.experimental import pallas as pl
from jax.experimental.pallas import tpu as pltpu


# ----------------------------- kernel --------------------------------------


def _layer_norm(x, g, b, eps=1e-5):
    mu = jnp.mean(x, axis=-1, keepdims=True)
    xc = x - mu
    var = jnp.mean(xc * xc, axis=-1, keepdims=True)
    return xc * jax.lax.rsqrt(var + eps) * g + b


def encoder_kernel(x_ref, mask_ref, kpm_ref,
                   wqkv_ref, bqkv_ref, wo_ref, w1_ref, b1_ref, w2_ref,
                   pvec_ref, fnorm_ref, o_ref, *, n_heads):
    """Grid = (B // Bt,). One invocation runs ALL encoder layers (eval mode) for Bt sequences.
    All weights are full-L resident VMEM blocks (constant index_map -> DMA'd once)."""
    Bt, S, H = x_ref.shape
    n_layers = wqkv_ref.shape[0]
    dh = H // n_heads

    # Additive attention masks built in-register once: (S,S) attn mask + (1,S) key-padding row.
    attn_mask = mask_ref[...]                         # (S, S) f32
    kpm = kpm_ref[...]                                # (Bt, 1, S) f32
    add_masks = [attn_mask + kpm[b] for b in range(Bt)]

    # Activation carried across layers in-register, flattened so the linear dots see M = Bt*S.
    x = x_ref[...].reshape(Bt * S, H)                 # (Bt*S, H) f32

    for l in range(n_layers):                         # static unroll over layers
        # Packed per-layer vectors: rows = [bo, b2, ln1_g, ln1_b, ln2_g, ln2_b]
        pvec = pvec_ref[l]                            # (6, H) f32
        bo, b2 = pvec[0:1, :], pvec[1:2, :]
        g1, be1 = pvec[2:3, :], pvec[3:4, :]
        g2, be2 = pvec[4:5, :], pvec[5:6, :]

        # --- self attention (bf16 MXU inputs, f32 accumulation) ---
        # 1/sqrt(dh) is pre-folded into the Q columns of wqkv / bqkv at parameter prep time.
        qkv = jnp.dot(x.astype(jnp.bfloat16), wqkv_ref[l],
                      preferred_element_type=jnp.float32) + bqkv_ref[l]      # (Bt*S, 3H) f32
        qkv = qkv.astype(jnp.bfloat16).reshape(Bt, S, 3 * H)  # cast once, slice bf16 below

        ctx_rows = []
        for b in range(Bt):                           # static unroll over batch block
            qkv_b = qkv[b]                            # (S, 3H) bf16
            heads = []
            for h in range(n_heads):                  # static unroll over heads
                q = qkv_b[:, h * dh:(h + 1) * dh]
                k = qkv_b[:, H + h * dh:H + (h + 1) * dh]
                v = qkv_b[:, 2 * H + h * dh:2 * H + (h + 1) * dh]
                # contract dh of both operands -> no explicit K transpose (no XLU transpose)
                s = jax.lax.dot_general(q, k, (((1,), (1,)), ((), ())),
                                        preferred_element_type=jnp.float32) + add_masks[b]
                s = s - jnp.max(s, axis=-1, keepdims=True)
                p = jnp.exp(s)
                p = p / jnp.sum(p, axis=-1, keepdims=True)   # exact reciprocal (rows sum to 1)
                heads.append(jnp.dot(p.astype(jnp.bfloat16), v,
                                     preferred_element_type=jnp.float32))
            ctx_rows.append(jnp.concatenate(heads, axis=-1))  # (S, H) f32
        ctx = jnp.concatenate(ctx_rows, axis=0)       # (Bt*S, H) f32

        attn = jnp.dot(ctx.astype(jnp.bfloat16), wo_ref[l],
                       preferred_element_type=jnp.float32) + bo   # single H-wide out projection

        # --- residual + norm1 (post-norm) ---
        h1 = _layer_norm(x + attn, g1, be1)

        # --- feed-forward ---
        f = jnp.dot(h1.astype(jnp.bfloat16), w1_ref[l],
                    preferred_element_type=jnp.float32) + b1_ref[l]
        f = jnp.maximum(f, 0.0)                       # ReLU (PyTorch default activation)
        f = jnp.dot(f.astype(jnp.bfloat16), w2_ref[l],
                    preferred_element_type=jnp.float32) + b2

        # --- residual + norm2 ---
        x = _layer_norm(h1 + f, g2, be2)

    # --- encoder's final LayerNorm, single writeback ---
    fnorm = fnorm_ref[...]                            # (2, H): [gamma, beta]
    y = _layer_norm(x, fnorm[0:1, :], fnorm[1:2, :])
    o_ref[...] = y.reshape(Bt, S, H).astype(o_ref.dtype)


# ----------------------------- pallas_call wrapper --------------------------


def _pick_batch_block(B):
    """Keep >= 2 batch grid steps when possible (feeds both v7x TensorCores)."""
    if B <= 1:
        return 1
    bt = max(1, B // 2)
    while B % bt:
        bt -= 1
    return bt


def fused_encoder_call(x, mask2d, kpm, stacked, *, n_heads, batch_block=None):
    B, S, H = x.shape
    L = stacked['wqkv'].shape[0]
    PF = stacked['w1'].shape[-1]
    Bt = batch_block if batch_block is not None else _pick_batch_block(B)
    assert B % Bt == 0

    const3 = lambda i: (0, 0, 0)   # full-L resident weight blocks: DMA'd once, stay in VMEM
    in_specs = [
        pl.BlockSpec((Bt, S, H), lambda i: (i, 0, 0)),        # embedded input
        pl.BlockSpec((S, S), lambda i: (0, 0)),               # additive attention mask
        pl.BlockSpec((Bt, 1, S), lambda i: (i, 0, 0)),        # key-padding additive rows
        pl.BlockSpec((L, H, 3 * H), const3),                  # Wqkv^T (bf16, scale folded)
        pl.BlockSpec((L, 1, 3 * H), const3),                  # bqkv   (scale folded into q part)
        pl.BlockSpec((L, H, H), const3),                      # Wo^T   (bf16)
        pl.BlockSpec((L, H, PF), const3),                     # W1^T   (bf16)
        pl.BlockSpec((L, 1, PF), const3),                     # b1
        pl.BlockSpec((L, PF, H), const3),                     # W2^T   (bf16)
        pl.BlockSpec((L, 6, H), const3),                      # packed [bo,b2,ln1g,ln1b,ln2g,ln2b]
        pl.BlockSpec((2, H), lambda i: (0, 0)),               # final LayerNorm [gamma, beta]
    ]
    return pl.pallas_call(
        functools.partial(encoder_kernel, n_heads=n_heads),
        out_shape=jax.ShapeDtypeStruct((B, S, H), jnp.float32),
        grid=(B // Bt,),
        in_specs=in_specs,
        out_specs=pl.BlockSpec((Bt, S, H), lambda i: (i, 0, 0)),
        compiler_params=pltpu.CompilerParams(
            dimension_semantics=("parallel",),
            vmem_limit_bytes=48 * 1024 * 1024),   # under v7x's 64 MiB/TC; raise on v5e/v6e
    )(x, mask2d, kpm, stacked['wqkv'], stacked['bqkv'], stacked['wo'],
      stacked['w1'], stacked['b1'], stacked['w2'], stacked['pvec'], stacked['fnorm'])


# ----------------------------- one-time parameter preparation ---------------


def prepare_weights(params, *, n_heads):
    """Stack / pack / cast all per-layer weights ONCE (hoisted out of the forward path)."""
    H = params['tok_emb'].shape[1]
    dh = H // n_heads
    scale = 1.0 / float(dh) ** 0.5
    layers = params['layers']

    wqkv_list, bqkv_list = [], []
    for lp in layers:
        # fold 1/sqrt(dh) into the Q columns of Wqkv and the q part of bqkv
        wqkv = lp['wqkv_t'].at[:, :H].multiply(scale)
        bqkv = lp['bqkv'].at[:, :H].multiply(scale)
        wqkv_list.append(wqkv)
        bqkv_list.append(bqkv)

    return dict(
        wqkv=jnp.stack(wqkv_list).astype(jnp.bfloat16),
        bqkv=jnp.stack(bqkv_list),
        wo=jnp.stack([lp['wo_t'] for lp in layers]).astype(jnp.bfloat16),
        w1=jnp.stack([lp['w1_t'] for lp in layers]).astype(jnp.bfloat16),
        b1=jnp.stack([lp['b1'] for lp in layers]),
        w2=jnp.stack([lp['w2_t'] for lp in layers]).astype(jnp.bfloat16),
        pvec=jnp.stack([jnp.concatenate(
            [lp['bo'], lp['b2'], lp['ln1_g'], lp['ln1_b'], lp['ln2_g'], lp['ln2_b']],
            axis=0) for lp in layers]),
        fnorm=jnp.concatenate([params['norm_g'], params['norm_b']], axis=0),
    )


def transformer_encoder_forward(params, prepared, src, src_mask, src_padding_mask, *, n_heads):
    """Mirrors TransformerEncoder.forward (eval / is_training=False path)."""
    B, S = src.shape
    H = params['tok_emb'].shape[1]
    # embedding gather + scale + positional add (JAX glue)
    tok = jnp.take(params['tok_emb'], src, axis=0)               # (B, S, H)
    pos = params['pos_emb'][:S]                                  # (S, H)
    x = tok * jnp.sqrt(jnp.float32(H)) + pos[None, :, :]
    # TODO(synk): training-mode dropout (embedding + in-layer) not implemented; eval semantics.

    mask2d = src_mask.astype(jnp.float32)                        # (S, S)
    kpm = jnp.where(src_padding_mask, jnp.float32(-1e9),
                    jnp.float32(0.0)).reshape(B, 1, S)           # (B, 1, S)
    return fused_encoder_call(x, mask2d, kpm, prepared, n_heads=n_heads)


# ----------------------------- deterministic parameters ---------------------


def init_params(key, input_dim, hid_dim, n_layers, pf_dim, max_length=128):
    keys = jax.random.split(key, 2 + n_layers)
    tok = jax.random.normal(keys[0], (input_dim, hid_dim), jnp.float32) * 0.1
    tok = tok.at[0].set(0.0)    # padding_idx=0
    pos = jax.random.normal(keys[1], (max_length, hid_dim), jnp.float32) * 0.1
    pos = pos.at[0].set(0.0)    # padding_idx=0
    layers = []
    for l in range(n_layers):
        ks = jax.random.split(keys[2 + l], 8)
        wqkv = jax.random.normal(ks[0], (3 * hid_dim, hid_dim), jnp.float32) * 0.1
        bqkv = jax.random.normal(ks[1], (3 * hid_dim,), jnp.float32) * 0.01
        wo = jax.random.normal(ks[2], (hid_dim, hid_dim), jnp.float32) * 0.1
        bo = jax.random.normal(ks[3], (hid_dim,), jnp.float32) * 0.01
        w1 = jax.random.normal(ks[4], (pf_dim, hid_dim), jnp.float32) * 0.1
        b1 = jax.random.normal(ks[5], (pf_dim,), jnp.float32) * 0.01
        w2 = jax.random.normal(ks[6], (hid_dim, pf_dim), jnp.float32) * 0.1
        b2 = jax.random.normal(ks[7], (hid_dim,), jnp.float32) * 0.01
        layers.append(dict(
            wqkv_t=wqkv.T, bqkv=bqkv[None, :],
            wo_t=wo.T, bo=bo[None, :],
            w1_t=w1.T, b1=b1[None, :],
            w2_t=w2.T, b2=b2[None, :],
            ln1_g=jnp.ones((1, hid_dim), jnp.float32), ln1_b=jnp.zeros((1, hid_dim), jnp.float32),
            ln2_g=jnp.ones((1, hid_dim), jnp.float32), ln2_b=jnp.zeros((1, hid_dim), jnp.float32)))
    return dict(tok_emb=tok, pos_emb=pos, layers=layers,
                norm_g=jnp.ones((1, hid_dim), jnp.float32),
                norm_b=jnp.zeros((1, hid_dim), jnp.float32))


# ----------------------------- pure-JAX reference (f32, sanity check) -------


def _ln_ref(x, g, b, eps=1e-5):
    mu = jnp.mean(x, axis=-1, keepdims=True)
    var = jnp.mean((x - mu) ** 2, axis=-1, keepdims=True)
    return (x - mu) * jax.lax.rsqrt(var + eps) * g + b


def reference_forward(params, src, src_mask, src_padding_mask, *, n_heads):
    B, S = src.shape
    H = params['tok_emb'].shape[1]
    x = jnp.take(params['tok_emb'], src, axis=0) * jnp.sqrt(jnp.float32(H)) \
        + params['pos_emb'][:S][None]
    kpm_add = jnp.where(src_padding_mask, jnp.float32(-1e9), jnp.float32(0.0))
    mask = src_mask.astype(jnp.float32)[None] + kpm_add[:, None, :]   # (B,S,S)
    for lp in params['layers']:
        dh = H // n_heads
        qkv = x @ lp['wqkv_t'] + lp['bqkv'][0]
        q, k, v = jnp.split(qkv, 3, axis=-1)
        sp = lambda t: t.reshape(B, S, n_heads, dh).transpose(0, 2, 1, 3)
        q, k, v = sp(q), sp(k), sp(v)
        s = jnp.einsum('bhqd,bhkd->bhqk', q, k) / jnp.sqrt(jnp.float32(dh)) + mask[:, None]
        p = jax.nn.softmax(s, axis=-1)
        ctx = jnp.einsum('bhqk,bhkd->bhqd', p, v).transpose(0, 2, 1, 3).reshape(B, S, H)
        attn = ctx @ lp['wo_t'] + lp['bo'][0]
        h1 = _ln_ref(x + attn, lp['ln1_g'][0], lp['ln1_b'][0])
        f = jax.nn.relu(h1 @ lp['w1_t'] + lp['b1'][0]) @ lp['w2_t'] + lp['b2'][0]
        x = _ln_ref(h1 + f, lp['ln2_g'][0], lp['ln2_b'][0])
    return _ln_ref(x, params['norm_g'][0], params['norm_b'][0])


# ----------------------------- main -----------------------------------------


if __name__ == "__main__":
    INPUT_DIM, HID, N_LAYERS, N_HEADS, PF, MAXLEN = 50, 32, 2, 4, 64, 128
    B, S = 2, 8

    key = jax.random.PRNGKey(0)
    pkey, skey = jax.random.split(key)
    params = init_params(pkey, INPUT_DIM, HID, N_LAYERS, PF, MAXLEN)
    prepared = prepare_weights(params, n_heads=N_HEADS)   # one-time stacking / bf16 / scale-fold

    src = jax.random.randint(skey, (B, S), 1, INPUT_DIM, dtype=jnp.int32)
    src = src.at[:, -2:].set(0)                 # pad last two positions (padding_idx=0)
    src_padding_mask = (src == 0)               # (B, S) bool, True = padded key
    src_mask = jnp.zeros((S, S), jnp.float32)   # additive attention mask

    out = transformer_encoder_forward(params, prepared, src, src_mask, src_padding_mask,
                                      n_heads=N_HEADS)
    out = jax.block_until_ready(out)

    ref = reference_forward(params, src, src_mask, src_padding_mask, n_heads=N_HEADS)
    assert out.shape == (B, S, HID), out.shape
    # Kernel uses bf16 MXU inputs with f32 accumulation (exact softmax reciprocal);
    # reference is pure f32 -> tolerance covers bf16 rounding over 2 layers.
    max_err = float(jnp.max(jnp.abs(out - ref)))
    assert bool(jnp.allclose(out, ref, atol=3e-2, rtol=3e-2)), max_err

    print("KERNEL_OK")
</pallas_src>

<mosaic_0001>
module attributes {stable_mosaic.version = 11 : i64} {
  func.func @encoder_kernel(%arg0: i32, %arg1: memref<1x8x32xf32, #tpu.memory_space<vmem>>, %arg2: memref<8x8xf32, #tpu.memory_space<vmem>>, %arg3: memref<1x1x8xf32, #tpu.memory_space<vmem>>, %arg4: memref<2x32x96xbf16, #tpu.memory_space<vmem>>, %arg5: memref<2x1x96xf32, #tpu.memory_space<vmem>>, %arg6: memref<2x32x32xbf16, #tpu.memory_space<vmem>>, %arg7: memref<2x32x64xbf16, #tpu.memory_space<vmem>>, %arg8: memref<2x1x64xf32, #tpu.memory_space<vmem>>, %arg9: memref<2x64x32xbf16, #tpu.memory_space<vmem>>, %arg10: memref<2x6x32xf32, #tpu.memory_space<vmem>>, %arg11: memref<2x32xf32, #tpu.memory_space<vmem>>, %arg12: memref<1x8x32xf32, #tpu.memory_space<vmem>>) attributes {dimension_semantics = [#tpu.dimension_semantics<parallel>], iteration_bounds = array<i64: 2>, scalar_prefetch = 0 : i64, scratch_operands = 0 : i64, tpu.core_type = #tpu.core_type<tc>, window_params = [{transform_indices = @transform_0, window_bounds = array<i64: 1, 8, 32>}, {pipeline_mode = #tpu.pipeline_mode<synchronous>, transform_indices = @transform_1, window_bounds = array<i64: 8, 8>}, {transform_indices = @transform_2, window_bounds = array<i64: 1, 1, 8>}, {pipeline_mode = #tpu.pipeline_mode<synchronous>, transform_indices = @transform_3, window_bounds = array<i64: 2, 32, 96>}, {pipeline_mode = #tpu.pipeline_mode<synchronous>, transform_indices = @transform_4, window_bounds = array<i64: 2, 1, 96>}, {pipeline_mode = #tpu.pipeline_mode<synchronous>, transform_indices = @transform_5, window_bounds = array<i64: 2, 32, 32>}, {pipeline_mode = #tpu.pipeline_mode<synchronous>, transform_indices = @transform_6, window_bounds = array<i64: 2, 32, 64>}, {pipeline_mode = #tpu.pipeline_mode<synchronous>, transform_indices = @transform_7, window_bounds = array<i64: 2, 1, 64>}, {pipeline_mode = #tpu.pipeline_mode<synchronous>, transform_indices = @transform_8, window_bounds = array<i64: 2, 64, 32>}, {pipeline_mode = #tpu.pipeline_mode<synchronous>, transform_indices = @transform_9, window_bounds = array<i64: 2, 6, 32>}, {pipeline_mode = #tpu.pipeline_mode<synchronous>, transform_indices = @transform_10, window_bounds = array<i64: 2, 32>}, {transform_indices = @transform_11, window_bounds = array<i64: 1, 8, 32>}]} {
    %c0 = arith.constant 0 : index
    %c0_0 = arith.constant 0 : index
    %0 = vector.load %arg2[%c0, %c0_0] : memref<8x8xf32, #tpu.memory_space<vmem>>, vector<8x8xf32>
    %c0_1 = arith.constant 0 : index
    %c0_2 = arith.constant 0 : index
    %c0_3 = arith.constant 0 : index
    %1 = vector.load %arg3[%c0_1, %c0_2, %c0_3] : memref<1x1x8xf32, #tpu.memory_space<vmem>>, vector<1x1x8xf32>
    %2 = vector.shape_cast %1 : vector<1x1x8xf32> to vector<1x8xf32>
    %3 = vector.broadcast %2 : vector<1x8xf32> to vector<8x8xf32>
    %4 = arith.addf %0, %3 : vector<8x8xf32>
    %c0_4 = arith.constant 0 : index
    %c0_5 = arith.constant 0 : index
    %c0_6 = arith.constant 0 : index
    %5 = vector.load %arg1[%c0_4, %c0_5, %c0_6] : memref<1x8x32xf32, #tpu.memory_space<vmem>>, vector<1x8x32xf32>
    %6 = vector.shape_cast %5 : vector<1x8x32xf32> to vector<8x32xf32>
    %c0_7 = arith.constant 0 : index
    %c0_8 = arith.constant 0 : index
    %c0_9 = arith.constant 0 : index
    %7 = vector.load %arg10[%c0_7, %c0_8, %c0_9] : memref<2x6x32xf32, #tpu.memory_space<vmem>>, vector<1x6x32xf32>
    %8 = vector.shape_cast %7 : vector<1x6x32xf32> to vector<6x32xf32>
    %9 = vector.extract_strided_slice %8 {offsets = [0, 0], sizes = [1, 32], strides = [1, 1]} : vector<6x32xf32> to vector<1x32xf32>
    %10 = vector.extract_strided_slice %8 {offsets = [1, 0], sizes = [1, 32], strides = [1, 1]} : vector<6x32xf32> to vector<1x32xf32>
    %11 = vector.extract_strided_slice %8 {offsets = [2, 0], sizes = [1, 32], strides = [1, 1]} : vector<6x32xf32> to vector<1x32xf32>
    %12 = vector.extract_strided_slice %8 {offsets = [3, 0], sizes = [1, 32], strides = [1, 1]} : vector<6x32xf32> to vector<1x32xf32>
    %13 = vector.extract_strided_slice %8 {offsets = [4, 0], sizes = [1, 32], strides = [1, 1]} : vector<6x32xf32> to vector<1x32xf32>
    %14 = vector.extract_strided_slice %8 {offsets = [5, 0], sizes = [1, 32], strides = [1, 1]} : vector<6x32xf32> to vector<1x32xf32>
    %15 = arith.truncf %6 : vector<8x32xf32> to vector<8x32xbf16>
    %c0_10 = arith.constant 0 : index
    %c0_11 = arith.constant 0 : index
    %c0_12 = arith.constant 0 : index
    %16 = vector.load %arg4[%c0_10, %c0_11, %c0_12] : memref<2x32x96xbf16, #tpu.memory_space<vmem>>, vector<1x32x96xbf16>
    %17 = vector.shape_cast %16 : vector<1x32x96xbf16> to vector<32x96xbf16>
    %cst = arith.constant dense<0.000000e+00> : vector<8x96xf32>
    %18 = tpu.matmul %15, %17, %cst {dimension_numbers = #tpu.dot_dimension_numbers<[1], [0], [0], [1], [0, 0, 1, 1], [], []>} : vector<8x32xbf16>, vector<32x96xbf16>, vector<8x96xf32> -> vector<8x96xf32>
    %c0_13 = arith.constant 0 : index
    %c0_14 = arith.constant 0 : index
    %c0_15 = arith.constant 0 : index
    %19 = vector.load %arg5[%c0_13, %c0_14, %c0_15] : memref<2x1x96xf32, #tpu.memory_space<vmem>>, vector<1x1x96xf32>
    %20 = vector.shape_cast %19 : vector<1x1x96xf32> to vector<1x96xf32>
    %21 = vector.broadcast %20 : vector<1x96xf32> to vector<8x96xf32>
    %22 = arith.addf %18, %21 : vector<8x96xf32>
    %23 = arith.truncf %22 : vector<8x96xf32> to vector<8x96xbf16>
    %24 = vector.shape_cast %23 : vector<8x96xbf16> to vector<1x8x96xbf16>
    %25 = vector.shape_cast %24 : vector<1x8x96xbf16> to vector<8x96xbf16>
    %26 = vector.extract_strided_slice %25 {offsets = [0, 0], sizes = [8, 8], strides = [1, 1]} : vector<8x96xbf16> to vector<8x8xbf16>
    %27 = vector.extract_strided_slice %25 {offsets = [0, 32], sizes = [8, 8], strides = [1, 1]} : vector<8x96xbf16> to vector<8x8xbf16>
    %28 = vector.extract_strided_slice %25 {offsets = [0, 64], sizes = [8, 8], strides = [1, 1]} : vector<8x96xbf16> to vector<8x8xbf16>
    %cst_16 = arith.constant dense<0.000000e+00> : vector<8x8xf32>
    %29 = tpu.matmul %26, %27, %cst_16 {dimension_numbers = #tpu.dot_dimension_numbers<[1], [1], [0], [0], [0, 0, 1, 0], [], []>} : vector<8x8xbf16>, vector<8x8xbf16>, vector<8x8xf32> -> vector<8x8xf32>
    %30 = arith.addf %29, %4 : vector<8x8xf32>
    %cst_17 = arith.constant dense<0xFF800000> : vector<8xf32>
    %31 = vector.multi_reduction <maximumf>, %30, %cst_17 [1] : vector<8x8xf32> to vector<8xf32>
    %32 = vector.shape_cast %31 : vector<8xf32> to vector<8x1xf32>
    %33 = vector.broadcast %32 : vector<8x1xf32> to vector<8x8xf32>
    %34 = arith.subf %30, %33 : vector<8x8xf32>
    %35 = math.exp %34 : vector<8x8xf32>
    %cst_18 = arith.constant dense<0.000000e+00> : vector<8xf32>
    %36 = vector.multi_reduction <add>, %35, %cst_18 [1] : vector<8x8xf32> to vector<8xf32>
    %37 = vector.shape_cast %36 : vector<8xf32> to vector<8x1xf32>
    %38 = vector.broadcast %37 : vector<8x1xf32> to vector<8x8xf32>
    %39 = arith.divf %35, %38 : vector<8x8xf32>
    %40 = arith.truncf %39 : vector<8x8xf32> to vector<8x8xbf16>
    %cst_19 = arith.constant dense<0.000000e+00> : vector<8x8xf32>
    %41 = tpu.matmul %40, %28, %cst_19 {dimension_numbers = #tpu.dot_dimension_numbers<[1], [0], [0], [1], [0, 0, 1, 1], [], []>} : vector<8x8xbf16>, vector<8x8xbf16>, vector<8x8xf32> -> vector<8x8xf32>
    %42 = vector.extract_strided_slice %25 {offsets = [0, 8], sizes = [8, 8], strides = [1, 1]} : vector<8x96xbf16> to vector<8x8xbf16>
    %43 = vector.extract_strided_slice %25 {offsets = [0, 40], sizes = [8, 8], strides = [1, 1]} : vector<8x96xbf16> to vector<8x8xbf16>
    %44 = vector.extract_strided_slice %25 {offsets = [0, 72], sizes = [8, 8], strides = [1, 1]} : vector<8x96xbf16> to vector<8x8xbf16>
    %cst_20 = arith.constant dense<0.000000e+00> : vector<8x8xf32>
    %45 = tpu.matmul %42, %43, %cst_20 {dimension_numbers = #tpu.dot_dimension_numbers<[1], [1], [0], [0], [0, 0, 1, 0], [], []>} : vector<8x8xbf16>, vector<8x8xbf16>, vector<8x8xf32> -> vector<8x8xf32>
    %46 = arith.addf %45, %4 : vector<8x8xf32>
    %cst_21 = arith.constant dense<0xFF800000> : vector<8xf32>
    %47 = vector.multi_reduction <maximumf>, %46, %cst_21 [1] : vector<8x8xf32> to vector<8xf32>
    %48 = vector.shape_cast %47 : vector<8xf32> to vector<8x1xf32>
    %49 = vector.broadcast %48 : vector<8x1xf32> to vector<8x8xf32>
    %50 = arith.subf %46, %49 : vector<8x8xf32>
    %51 = math.exp %50 : vector<8x8xf32>
    %cst_22 = arith.constant dense<0.000000e+00> : vector<8xf32>
    %52 = vector.multi_reduction <add>, %51, %cst_22 [1] : vector<8x8xf32> to vector<8xf32>
    %53 = vector.shape_cast %52 : vector<8xf32> to vector<8x1xf32>
    %54 = vector.broadcast %53 : vector<8x1xf32> to vector<8x8xf32>
    %55 = arith.divf %51, %54 : vector<8x8xf32>
    %56 = arith.truncf %55 : vector<8x8xf32> to vector<8x8xbf16>
    %cst_23 = arith.constant dense<0.000000e+00> : vector<8x8xf32>
    %57 = tpu.matmul %56, %44, %cst_23 {dimension_numbers = #tpu.dot_dimension_numbers<[1], [0], [0], [1], [0, 0, 1, 1], [], []>} : vector<8x8xbf16>, vector<8x8xbf16>, vector<8x8xf32> -> vector<8x8xf32>
    %58 = vector.extract_strided_slice %25 {offsets = [0, 16], sizes = [8, 8], strides = [1, 1]} : vector<8x96xbf16> to vector<8x8xbf16>
    %59 = vector.extract_strided_slice %25 {offsets = [0, 48], sizes = [8, 8], strides = [1, 1]} : vector<8x96xbf16> to vector<8x8xbf16>
    %60 = vector.extract_strided_slice %25 {offsets = [0, 80], sizes = [8, 8], strides = [1, 1]} : vector<8x96xbf16> to vector<8x8xbf16>
    %cst_24 = arith.constant dense<0.000000e+00> : vector<8x8xf32>
    %61 = tpu.matmul %58, %59, %cst_24 {dimension_numbers = #tpu.dot_dimension_numbers<[1], [1], [0], [0], [0, 0, 1, 0], [], []>} : vector<8x8xbf16>, vector<8x8xbf16>, vector<8x8xf32> -> vector<8x8xf32>
    %62 = arith.addf %61, %4 : vector<8x8xf32>
    %cst_25 = arith.constant dense<0xFF800000> : vector<8xf32>
    %63 = vector.multi_reduction <maximumf>, %62, %cst_25 [1] : vector<8x8xf32> to vector<8xf32>
    %64 = vector.shape_cast %63 : vector<8xf32> to vector<8x1xf32>
    %65 = vector.broadcast %64 : vector<8x1xf32> to vector<8x8xf32>
    %66 = arith.subf %62, %65 : vector<8x8xf32>
    %67 = math.exp %66 : vector<8x8xf32>
    %cst_26 = arith.constant dense<0.000000e+00> : vector<8xf32>
    %68 = vector.multi_reduction <add>, %67, %cst_26 [1] : vector<8x8xf32> to vector<8xf32>
    %69 = vector.shape_cast %68 : vector<8xf32> to vector<8x1xf32>
    %70 = vector.broadcast %69 : vector<8x1xf32> to vector<8x8xf32>
    %71 = arith.divf %67, %70 : vector<8x8xf32>
    %72 = arith.truncf %71 : vector<8x8xf32> to vector<8x8xbf16>
    %cst_27 = arith.constant dense<0.000000e+00> : vector<8x8xf32>
    %73 = tpu.matmul %72, %60, %cst_27 {dimension_numbers = #tpu.dot_dimension_numbers<[1], [0], [0], [1], [0, 0, 1, 1], [], []>} : vector<8x8xbf16>, vector<8x8xbf16>, vector<8x8xf32> -> vector<8x8xf32>
    %74 = vector.extract_strided_slice %25 {offsets = [0, 24], sizes = [8, 8], strides = [1, 1]} : vector<8x96xbf16> to vector<8x8xbf16>
    %75 = vector.extract_strided_slice %25 {offsets = [0, 56], sizes = [8, 8], strides = [1, 1]} : vector<8x96xbf16> to vector<8x8xbf16>
    %76 = vector.extract_strided_slice %25 {offsets = [0, 88], sizes = [8, 8], strides = [1, 1]} : vector<8x96xbf16> to vector<8x8xbf16>
    %cst_28 = arith.constant dense<0.000000e+00> : vector<8x8xf32>
    %77 = tpu.matmul %74, %75, %cst_28 {dimension_numbers = #tpu.dot_dimension_numbers<[1], [1], [0], [0], [0, 0, 1, 0], [], []>} : vector<8x8xbf16>, vector<8x8xbf16>, vector<8x8xf32> -> vector<8x8xf32>
    %78 = arith.addf %77, %4 : vector<8x8xf32>
    %cst_29 = arith.constant dense<0xFF800000> : vector<8xf32>
    %79 = vector.multi_reduction <maximumf>, %78, %cst_29 [1] : vector<8x8xf32> to vector<8xf32>
    %80 = vector.shape_cast %79 : vector<8xf32> to vector<8x1xf32>
    %81 = vector.broadcast %80 : vector<8x1xf32> to vector<8x8xf32>
    %82 = arith.subf %78, %81 : vector<8x8xf32>
    %83 = math.exp %82 : vector<8x8xf32>
    %cst_30 = arith.constant dense<0.000000e+00> : vector<8xf32>
    %84 = vector.multi_reduction <add>, %83, %cst_30 [1] : vector<8x8xf32> to vector<8xf32>
    %85 = vector.shape_cast %84 : vector<8xf32> to vector<8x1xf32>
    %86 = vector.broadcast %85 : vector<8x1xf32> to vector<8x8xf32>
    %87 = arith.divf %83, %86 : vector<8x8xf32>
    %88 = arith.truncf %87 : vector<8x8xf32> to vector<8x8xbf16>
    %cst_31 = arith.constant dense<0.000000e+00> : vector<8x8xf32>
    %89 = tpu.matmul %88, %76, %cst_31 {dimension_numbers = #tpu.dot_dimension_numbers<[1], [0], [0], [1], [0, 0, 1, 1], [], []>} : vector<8x8xbf16>, vector<8x8xbf16>, vector<8x8xf32> -> vector<8x8xf32>
    %90 = tpu.concatenate %41, %57, %73, %89 in 1 : vector<8x8xf32>, vector<8x8xf32>, vector<8x8xf32>, vector<8x8xf32> -> vector<8x32xf32>
    %91 = arith.truncf %90 : vector<8x32xf32> to vector<8x32xbf16>
    %c0_32 = arith.constant 0 : index
    %c0_33 = arith.constant 0 : index
    %c0_34 = arith.constant 0 : index
    %92 = vector.load %arg6[%c0_32, %c0_33, %c0_34] : memref<2x32x32xbf16, #tpu.memory_space<vmem>>, vector<1x32x32xbf16>
    %93 = vector.shape_cast %92 : vector<1x32x32xbf16> to vector<32x32xbf16>
    %cst_35 = arith.constant dense<0.000000e+00> : vector<8x32xf32>
    %94 = tpu.matmul %91, %93, %cst_35 {dimension_numbers = #tpu.dot_dimension_numbers<[1], [0], [0], [1], [0, 0, 1, 1], [], []>} : vector<8x32xbf16>, vector<32x32xbf16>, vector<8x32xf32> -> vector<8x32xf32>
    %95 = vector.broadcast %9 : vector<1x32xf32> to vector<8x32xf32>
    %96 = arith.addf %94, %95 : vector<8x32xf32>
    %97 = arith.addf %6, %96 : vector<8x32xf32>
    %cst_36 = arith.constant dense<0.000000e+00> : vector<8xf32>
    %98 = vector.multi_reduction <add>, %97, %cst_36 [1] : vector<8x32xf32> to vector<8xf32>
    %99 = vector.shape_cast %98 : vector<8xf32> to vector<8x1xf32>
    %cst_37 = arith.constant 3.200000e+01 : f32
    %100 = vector.broadcast %cst_37 : f32 to vector<8x1xf32>
    %101 = arith.divf %99, %100 : vector<8x1xf32>
    %102 = vector.broadcast %101 : vector<8x1xf32> to vector<8x32xf32>
    %103 = arith.subf %97, %102 : vector<8x32xf32>
    %104 = arith.mulf %103, %103 : vector<8x32xf32>
    %cst_38 = arith.constant dense<0.000000e+00> : vector<8xf32>
    %105 = vector.multi_reduction <add>, %104, %cst_38 [1] : vector<8x32xf32> to vector<8xf32>
    %106 = vector.shape_cast %105 : vector<8xf32> to vector<8x1xf32>
    %cst_39 = arith.constant 3.200000e+01 : f32
    %107 = vector.broadcast %cst_39 : f32 to vector<8x1xf32>
    %108 = arith.divf %106, %107 : vector<8x1xf32>
    %cst_40 = arith.constant 9.99999974E-6 : f32
    %109 = vector.broadcast %cst_40 : f32 to vector<8x1xf32>
    %110 = arith.addf %108, %109 : vector<8x1xf32>
    %111 = math.rsqrt %110 : vector<8x1xf32>
    %112 = vector.broadcast %111 : vector<8x1xf32> to vector<8x32xf32>
    %113 = arith.mulf %103, %112 : vector<8x32xf32>
    %114 = vector.broadcast %11 : vector<1x32xf32> to vector<8x32xf32>
    %115 = arith.mulf %113, %114 : vector<8x32xf32>
    %116 = vector.broadcast %12 : vector<1x32xf32> to vector<8x32xf32>
    %117 = arith.addf %115, %116 : vector<8x32xf32>
    %118 = arith.truncf %117 : vector<8x32xf32> to vector<8x32xbf16>
    %c0_41 = arith.constant 0 : index
    %c0_42 = arith.constant 0 : index
    %c0_43 = arith.constant 0 : index
    %119 = vector.load %arg7[%c0_41, %c0_42, %c0_43] : memref<2x32x64xbf16, #tpu.memory_space<vmem>>, vector<1x32x64xbf16>
    %120 = vector.shape_cast %119 : vector<1x32x64xbf16> to vector<32x64xbf16>
    %cst_44 = arith.constant dense<0.000000e+00> : vector<8x64xf32>
    %121 = tpu.matmul %118, %120, %cst_44 {dimension_numbers = #tpu.dot_dimension_numbers<[1], [0], [0], [1], [0, 0, 1, 1], [], []>} : vector<8x32xbf16>, vector<32x64xbf16>, vector<8x64xf32> -> vector<8x64xf32>
    %c0_45 = arith.constant 0 : index
    %c0_46 = arith.constant 0 : index
    %c0_47 = arith.constant 0 : index
    %122 = vector.load %arg8[%c0_45, %c0_46, %c0_47] : memref<2x1x64xf32, #tpu.memory_space<vmem>>, vector<1x1x64xf32>
    %123 = vector.shape_cast %122 : vector<1x1x64xf32> to vector<1x64xf32>
    %124 = vector.broadcast %123 : vector<1x64xf32> to vector<8x64xf32>
    %125 = arith.addf %121, %124 : vector<8x64xf32>
    %cst_48 = arith.constant 0.000000e+00 : f32
    %126 = vector.broadcast %cst_48 : f32 to vector<8x64xf32>
    %127 = arith.maximumf %125, %126 : vector<8x64xf32>
    %128 = arith.truncf %127 : vector<8x64xf32> to vector<8x64xbf16>
    %c0_49 = arith.constant 0 : index
    %c0_50 = arith.constant 0 : index
    %c0_51 = arith.constant 0 : index
    %129 = vector.load %arg9[%c0_49, %c0_50, %c0_51] : memref<2x64x32xbf16, #tpu.memory_space<vmem>>, vector<1x64x32xbf16>
    %130 = vector.shape_cast %129 : vector<1x64x32xbf16> to vector<64x32xbf16>
    %cst_52 = arith.constant dense<0.000000e+00> : vector<8x32xf32>
    %131 = tpu.matmul %128, %130, %cst_52 {dimension_numbers = #tpu.dot_dimension_numbers<[1], [0], [0], [1], [0, 0, 1, 1], [], []>} : vector<8x64xbf16>, vector<64x32xbf16>, vector<8x32xf32> -> vector<8x32xf32>
    %132 = vector.broadcast %10 : vector<1x32xf32> to vector<8x32xf32>
    %133 = arith.addf %131, %132 : vector<8x32xf32>
    %134 = arith.addf %117, %133 : vector<8x32xf32>
    %cst_53 = arith.constant dense<0.000000e+00> : vector<8xf32>
    %135 = vector.multi_reduction <add>, %134, %cst_53 [1] : vector<8x32xf32> to vector<8xf32>
    %136 = vector.shape_cast %135 : vector<8xf32> to vector<8x1xf32>
    %cst_54 = arith.constant 3.200000e+01 : f32
    %137 = vector.broadcast %cst_54 : f32 to vector<8x1xf32>
    %138 = arith.divf %136, %137 : vector<8x1xf32>
    %139 = vector.broadcast %138 : vector<8x1xf32> to vector<8x32xf32>
    %140 = arith.subf %134, %139 : vector<8x32xf32>
    %141 = arith.mulf %140, %140 : vector<8x32xf32>
    %cst_55 = arith.constant dense<0.000000e+00> : vector<8xf32>
    %142 = vector.multi_reduction <add>, %141, %cst_55 [1] : vector<8x32xf32> to vector<8xf32>
    %143 = vector.shape_cast %142 : vector<8xf32> to vector<8x1xf32>
    %cst_56 = arith.constant 3.200000e+01 : f32
    %144 = vector.broadcast %cst_56 : f32 to vector<8x1xf32>
    %145 = arith.divf %143, %144 : vector<8x1xf32>
    %cst_57 = arith.constant 9.99999974E-6 : f32
    %146 = vector.broadcast %cst_57 : f32 to vector<8x1xf32>
    %147 = arith.addf %145, %146 : vector<8x1xf32>
    %148 = math.rsqrt %147 : vector<8x1xf32>
    %149 = vector.broadcast %148 : vector<8x1xf32> to vector<8x32xf32>
    %150 = arith.mulf %140, %149 : vector<8x32xf32>
    %151 = vector.broadcast %13 : vector<1x32xf32> to vector<8x32xf32>
    %152 = arith.mulf %150, %151 : vector<8x32xf32>
    %153 = vector.broadcast %14 : vector<1x32xf32> to vector<8x32xf32>
    %154 = arith.addf %152, %153 : vector<8x32xf32>
    %c1 = arith.constant 1 : index
    %c0_58 = arith.constant 0 : index
    %c0_59 = arith.constant 0 : index
    %155 = vector.load %arg10[%c1, %c0_58, %c0_59] : memref<2x6x32xf32, #tpu.memory_space<vmem>>, vector<1x6x32xf32>
    %156 = vector.shape_cast %155 : vector<1x6x32xf32> to vector<6x32xf32>
    %157 = vector.extract_strided_slice %156 {offsets = [0, 0], sizes = [1, 32], strides = [1, 1]} : vector<6x32xf32> to vector<1x32xf32>
    %158 = vector.extract_strided_slice %156 {offsets = [1, 0], sizes = [1, 32], strides = [1, 1]} : vector<6x32xf32> to vector<1x32xf32>
    %159 = vector.extract_strided_slice %156 {offsets = [2, 0], sizes = [1, 32], strides = [1, 1]} : vector<6x32xf32> to vector<1x32xf32>
    %160 = vector.extract_strided_slice %156 {offsets = [3, 0], sizes = [1, 32], strides = [1, 1]} : vector<6x32xf32> to vector<1x32xf32>
    %161 = vector.extract_strided_slice %156 {offsets = [4, 0], sizes = [1, 32], strides = [1, 1]} : vector<6x32xf32> to vector<1x32xf32>
    %162 = vector.extract_strided_slice %156 {offsets = [5, 0], sizes = [1, 32], strides = [1, 1]} : vector<6x32xf32> to vector<1x32xf32>
    %163 = arith.truncf %154 : vector<8x32xf32> to vector<8x32xbf16>
    %c1_60 = arith.constant 1 : index
    %c0_61 = arith.constant 0 : index
    %c0_62 = arith.constant 0 : index
    %164 = vector.load %arg4[%c1_60, %c0_61, %c0_62] : memref<2x32x96xbf16, #tpu.memory_space<vmem>>, vector<1x32x96xbf16>
    %165 = vector.shape_cast %164 : vector<1x32x96xbf16> to vector<32x96xbf16>
    %cst_63 = arith.constant dense<0.000000e+00> : vector<8x96xf32>
    %166 = tpu.matmul %163, %165, %cst_63 {dimension_numbers = #tpu.dot_dimension_numbers<[1], [0], [0], [1], [0, 0, 1, 1], [], []>} : vector<8x32xbf16>, vector<32x96xbf16>, vector<8x96xf32> -> vector<8x96xf32>
    %c1_64 = arith.constant 1 : index
    %c0_65 = arith.constant 0 : index
    %c0_66 = arith.constant 0 : index
    %167 = vector.load %arg5[%c1_64, %c0_65, %c0_66] : memref<2x1x96xf32, #tpu.memory_space<vmem>>, vector<1x1x96xf32>
    %168 = vector.shape_cast %167 : vector<1x1x96xf32> to vector<1x96xf32>
    %169 = vector.broadcast %168 : vector<1x96xf32> to vector<8x96xf32>
    %170 = arith.addf %166, %169 : vector<8x96xf32>
    %171 = arith.truncf %170 : vector<8x96xf32> to vector<8x96xbf16>
    %172 = vector.shape_cast %171 : vector<8x96xbf16> to vector<1x8x96xbf16>
    %173 = vector.shape_cast %172 : vector<1x8x96xbf16> to vector<8x96xbf16>
    %174 = vector.extract_strided_slice %173 {offsets = [0, 0], sizes = [8, 8], strides = [1, 1]} : vector<8x96xbf16> to vector<8x8xbf16>
    %175 = vector.extract_strided_slice %173 {offsets = [0, 32], sizes = [8, 8], strides = [1, 1]} : vector<8x96xbf16> to vector<8x8xbf16>
    %176 = vector.extract_strided_slice %173 {offsets = [0, 64], sizes = [8, 8], strides = [1, 1]} : vector<8x96xbf16> to vector<8x8xbf16>
    %cst_67 = arith.constant dense<0.000000e+00> : vector<8x8xf32>
    %177 = tpu.matmul %174, %175, %cst_67 {dimension_numbers = #tpu.dot_dimension_numbers<[1], [1], [0], [0], [0, 0, 1, 0], [], []>} : vector<8x8xbf16>, vector<8x8xbf16>, vector<8x8xf32> -> vector<8x8xf32>
    %178 = arith.addf %177, %4 : vector<8x8xf32>
    %cst_68 = arith.constant dense<0xFF800000> : vector<8xf32>
    %179 = vector.multi_reduction <maximumf>, %178, %cst_68 [1] : vector<8x8xf32> to vector<8xf32>
    %180 = vector.shape_cast %179 : vector<8xf32> to vector<8x1xf32>
    %181 = vector.broadcast %180 : vector<8x1xf32> to vector<8x8xf32>
    %182 = arith.subf %178, %181 : vector<8x8xf32>
    %183 = math.exp %182 : vector<8x8xf32>
    %cst_69 = arith.constant dense<0.000000e+00> : vector<8xf32>
    %184 = vector.multi_reduction <add>, %183, %cst_69 [1] : vector<8x8xf32> to vector<8xf32>
    %185 = vector.shape_cast %184 : vector<8xf32> to vector<8x1xf32>
    %186 = vector.broadcast %185 : vector<8x1xf32> to vector<8x8xf32>
    %187 = arith.divf %183, %186 : vector<8x8xf32>
    %188 = arith.truncf %187 : vector<8x8xf32> to vector<8x8xbf16>
    %cst_70 = arith.constant dense<0.000000e+00> : vector<8x8xf32>
    %189 = tpu.matmul %188, %176, %cst_70 {dimension_numbers = #tpu.dot_dimension_numbers<[1], [0], [0], [1], [0, 0, 1, 1], [], []>} : vector<8x8xbf16>, vector<8x8xbf16>, vector<8x8xf32> -> vector<8x8xf32>
    %190 = vector.extract_strided_slice %173 {offsets = [0, 8], sizes = [8, 8], strides = [1, 1]} : vector<8x96xbf16> to vector<8x8xbf16>
    %191 = vector.extract_strided_slice %173 {offsets = [0, 40], sizes = [8, 8], strides = [1, 1]} : vector<8x96xbf16> to vector<8x8xbf16>
    %192 = vector.extract_strided_slice %173 {offsets = [0, 72], sizes = [8, 8], strides = [1, 1]} : vector<8x96xbf16> to vector<8x8xbf16>
    %cst_71 = arith.constant dense<0.000000e+00> : vector<8x8xf32>
    %193 = tpu.matmul %190, %191, %cst_71 {dimension_numbers = #tpu.dot_dimension_numbers<[1], [1], [0], [0], [0, 0, 1, 0], [], []>} : vector<8x8xbf16>, vector<8x8xbf16>, vector<8x8xf32> -> vector<8x8xf32>
    %194 = arith.addf %193, %4 : vector<8x8xf32>
    %cst_72 = arith.constant dense<0xFF800000> : vector<8xf32>
    %195 = vector.multi_reduction <maximumf>, %194, %cst_72 [1] : vector<8x8xf32> to vector<8xf32>
    %196 = vector.shape_cast %195 : vector<8xf32> to vector<8x1xf32>
    %197 = vector.broadcast %196 : vector<8x1xf32> to vector<8x8xf32>
    %198 = arith.subf %194, %197 : vector<8x8xf32>
    %199 = math.exp %198 : vector<8x8xf32>
    %cst_73 = arith.constant dense<0.000000e+00> : vector<8xf32>
    %200 = vector.multi_reduction <add>, %199, %cst_73 [1] : vector<8x8xf32> to vector<8xf32>
    %201 = vector.shape_cast %200 : vector<8xf32> to vector<8x1xf32>
    %202 = vector.broadcast %201 : vector<8x1xf32> to vector<8x8xf32>
    %203 = arith.divf %199, %202 : vector<8x8xf32>
    %204 = arith.truncf %203 : vector<8x8xf32> to vector<8x8xbf16>
    %cst_74 = arith.constant dense<0.000000e+00> : vector<8x8xf32>
    %205 = tpu.matmul %204, %192, %cst_74 {dimension_numbers = #tpu.dot_dimension_numbers<[1], [0], [0], [1], [0, 0, 1, 1], [], []>} : vector<8x8xbf16>, vector<8x8xbf16>, vector<8x8xf32> -> vector<8x8xf32>
    %206 = vector.extract_strided_slice %173 {offsets = [0, 16], sizes = [8, 8], strides = [1, 1]} : vector<8x96xbf16> to vector<8x8xbf16>
    %207 = vector.extract_strided_slice %173 {offsets = [0, 48], sizes = [8, 8], strides = [1, 1]} : vector<8x96xbf16> to vector<8x8xbf16>
    %208 = vector.extract_strided_slice %173 {offsets = [0, 80], sizes = [8, 8], strides = [1, 1]} : vector<8x96xbf16> to vector<8x8xbf16>
    %cst_75 = arith.constant dense<0.000000e+00> : vector<8x8xf32>
    %209 = tpu.matmul %206, %207, %cst_75 {dimension_numbers = #tpu.dot_dimension_numbers<[1], [1], [0], [0], [0, 0, 1, 0], [], []>} : vector<8x8xbf16>, vector<8x8xbf16>, vector<8x8xf32> -> vector<8x8xf32>
    %210 = arith.addf %209, %4 : vector<8x8xf32>
    %cst_76 = arith.constant dense<0xFF800000> : vector<8xf32>
    %211 = vector.multi_reduction <maximumf>, %210, %cst_76 [1] : vector<8x8xf32> to vector<8xf32>
    %212 = vector.shape_cast %211 : vector<8xf32> to vector<8x1xf32>
    %213 = vector.broadcast %212 : vector<8x1xf32> to vector<8x8xf32>
    %214 = arith.subf %210, %213 : vector<8x8xf32>
    %215 = math.exp %214 : vector<8x8xf32>
    %cst_77 = arith.constant dense<0.000000e+00> : vector<8xf32>
    %216 = vector.multi_reduction <add>, %215, %cst_77 [1] : vector<8x8xf32> to vector<8xf32>
    %217 = vector.shape_cast %216 : vector<8xf32> to vector<8x1xf32>
    %218 = vector.broadcast %217 : vector<8x1xf32> to vector<8x8xf32>
    %219 = arith.divf %215, %218 : vector<8x8xf32>
    %220 = arith.truncf %219 : vector<8x8xf32> to vector<8x8xbf16>
    %cst_78 = arith.constant dense<0.000000e+00> : vector<8x8xf32>
    %221 = tpu.matmul %220, %208, %cst_78 {dimension_numbers = #tpu.dot_dimension_numbers<[1], [0], [0], [1], [0, 0, 1, 1], [], []>} : vector<8x8xbf16>, vector<8x8xbf16>, vector<8x8xf32> -> vector<8x8xf32>
    %222 = vector.extract_strided_slice %173 {offsets = [0, 24], sizes = [8, 8], strides = [1, 1]} : vector<8x96xbf16> to vector<8x8xbf16>
    %223 = vector.extract_strided_slice %173 {offsets = [0, 56], sizes = [8, 8], strides = [1, 1]} : vector<8x96xbf16> to vector<8x8xbf16>
    %224 = vector.extract_strided_slice %173 {offsets = [0, 88], sizes = [8, 8], strides = [1, 1]} : vector<8x96xbf16> to vector<8x8xbf16>
    %cst_79 = arith.constant dense<0.000000e+00> : vector<8x8xf32>
    %225 = tpu.matmul %222, %223, %cst_79 {dimension_numbers = #tpu.dot_dimension_numbers<[1], [1], [0], [0], [0, 0, 1, 0], [], []>} : vector<8x8xbf16>, vector<8x8xbf16>, vector<8x8xf32> -> vector<8x8xf32>
    %226 = arith.addf %225, %4 : vector<8x8xf32>
    %cst_80 = arith.constant dense<0xFF800000> : vector<8xf32>
    %227 = vector.multi_reduction <maximumf>, %226, %cst_80 [1] : vector<8x8xf32> to vector<8xf32>
    %228 = vector.shape_cast %227 : vector<8xf32> to vector<8x1xf32>
    %229 = vector.broadcast %228 : vector<8x1xf32> to vector<8x8xf32>
    %230 = arith.subf %226, %229 : vector<8x8xf32>
    %231 = math.exp %230 : vector<8x8xf32>
    %cst_81 = arith.constant dense<0.000000e+00> : vector<8xf32>
    %232 = vector.multi_reduction <add>, %231, %cst_81 [1] : vector<8x8xf32> to vector<8xf32>
    %233 = vector.shape_cast %232 : vector<8xf32> to vector<8x1xf32>
    %234 = vector.broadcast %233 : vector<8x1xf32> to vector<8x8xf32>
    %235 = arith.divf %231, %234 : vector<8x8xf32>
    %236 = arith.truncf %235 : vector<8x8xf32> to vector<8x8xbf16>
    %cst_82 = arith.constant dense<0.000000e+00> : vector<8x8xf32>
    %237 = tpu.matmul %236, %224, %cst_82 {dimension_numbers = #tpu.dot_dimension_numbers<[1], [0], [0], [1], [0, 0, 1, 1], [], []>} : vector<8x8xbf16>, vector<8x8xbf16>, vector<8x8xf32> -> vector<8x8xf32>
    %238 = tpu.concatenate %189, %205, %221, %237 in 1 : vector<8x8xf32>, vector<8x8xf32>, vector<8x8xf32>, vector<8x8xf32> -> vector<8x32xf32>
    %239 = arith.truncf %238 : vector<8x32xf32> to vector<8x32xbf16>
    %c1_83 = arith.constant 1 : index
    %c0_84 = arith.constant 0 : index
    %c0_85 = arith.constant 0 : index
    %240 = vector.load %arg6[%c1_83, %c0_84, %c0_85] : memref<2x32x32xbf16, #tpu.memory_space<vmem>>, vector<1x32x32xbf16>
    %241 = vector.shape_cast %240 : vector<1x32x32xbf16> to vector<32x32xbf16>
    %cst_86 = arith.constant dense<0.000000e+00> : vector<8x32xf32>
    %242 = tpu.matmul %239, %241, %cst_86 {dimension_numbers = #tpu.dot_dimension_numbers<[1], [0], [0], [1], [0, 0, 1, 1], [], []>} : vector<8x32xbf16>, vector<32x32xbf16>, vector<8x32xf32> -> vector<8x32xf32>
    %243 = vector.broadcast %157 : vector<1x32xf32> to vector<8x32xf32>
    %244 = arith.addf %242, %243 : vector<8x32xf32>
    %245 = arith.addf %154, %244 : vector<8x32xf32>
    %cst_87 = arith.constant dense<0.000000e+00> : vector<8xf32>
    %246 = vector.multi_reduction <add>, %245, %cst_87 [1] : vector<8x32xf32> to vector<8xf32>
    %247 = vector.shape_cast %246 : vector<8xf32> to vector<8x1xf32>
    %cst_88 = arith.constant 3.200000e+01 : f32
    %248 = vector.broadcast %cst_88 : f32 to vector<8x1xf32>
    %249 = arith.divf %247, %248 : vector<8x1xf32>
    %250 = vector.broadcast %249 : vector<8x1xf32> to vector<8x32xf32>
    %251 = arith.subf %245, %250 : vector<8x32xf32>
    %252 = arith.mulf %251, %251 : vector<8x32xf32>
    %cst_89 = arith.constant dense<0.000000e+00> : vector<8xf32>
    %253 = vector.multi_reduction <add>, %252, %cst_89 [1] : vector<8x32xf32> to vector<8xf32>
    %254 = vector.shape_cast %253 : vector<8xf32> to vector<8x1xf32>
    %cst_90 = arith.constant 3.200000e+01 : f32
    %255 = vector.broadcast %cst_90 : f32 to vector<8x1xf32>
    %256 = arith.divf %254, %255 : vector<8x1xf32>
    %cst_91 = arith.constant 9.99999974E-6 : f32
    %257 = vector.broadcast %cst_91 : f32 to vector<8x1xf32>
    %258 = arith.addf %256, %257 : vector<8x1xf32>
    %259 = math.rsqrt %258 : vector<8x1xf32>
    %260 = vector.broadcast %259 : vector<8x1xf32> to vector<8x32xf32>
    %261 = arith.mulf %251, %260 : vector<8x32xf32>
    %262 = vector.broadcast %159 : vector<1x32xf32> to vector<8x32xf32>
    %263 = arith.mulf %261, %262 : vector<8x32xf32>
    %264 = vector.broadcast %160 : vector<1x32xf32> to vector<8x32xf32>
    %265 = arith.addf %263, %264 : vector<8x32xf32>
    %266 = arith.truncf %265 : vector<8x32xf32> to vector<8x32xbf16>
    %c1_92 = arith.constant 1 : index
    %c0_93 = arith.constant 0 : index
    %c0_94 = arith.constant 0 : index
    %267 = vector.load %arg7[%c1_92, %c0_93, %c0_94] : memref<2x32x64xbf16, #tpu.memory_space<vmem>>, vector<1x32x64xbf16>
    %268 = vector.shape_cast %267 : vector<1x32x64xbf16> to vector<32x64xbf16>
    %cst_95 = arith.constant dense<0.000000e+00> : vector<8x64xf32>
    %269 = tpu.matmul %266, %268, %cst_95 {dimension_numbers = #tpu.dot_dimension_numbers<[1], [0], [0], [1], [0, 0, 1, 1], [], []>} : vector<8x32xbf16>, vector<32x64xbf16>, vector<8x64xf32> -> vector<8x64xf32>
    %c1_96 = arith.constant 1 : index
    %c0_97 = arith.constant 0 : index
    %c0_98 = arith.constant 0 : index
    %270 = vector.load %arg8[%c1_96, %c0_97, %c0_98] : memref<2x1x64xf32, #tpu.memory_space<vmem>>, vector<1x1x64xf32>
    %271 = vector.shape_cast %270 : vector<1x1x64xf32> to vector<1x64xf32>
    %272 = vector.broadcast %271 : vector<1x64xf32> to vector<8x64xf32>
    %273 = arith.addf %269, %272 : vector<8x64xf32>
    %cst_99 = arith.constant 0.000000e+00 : f32
    %274 = vector.broadcast %cst_99 : f32 to vector<8x64xf32>
    %275 = arith.maximumf %273, %274 : vector<8x64xf32>
    %276 = arith.truncf %275 : vector<8x64xf32> to vector<8x64xbf16>
    %c1_100 = arith.constant 1 : index
    %c0_101 = arith.constant 0 : index
    %c0_102 = arith.constant 0 : index
    %277 = vector.load %arg9[%c1_100, %c0_101, %c0_102] : memref<2x64x32xbf16, #tpu.memory_space<vmem>>, vector<1x64x32xbf16>
    %278 = vector.shape_cast %277 : vector<1x64x32xbf16> to vector<64x32xbf16>
    %cst_103 = arith.constant dense<0.000000e+00> : vector<8x32xf32>
    %279 = tpu.matmul %276, %278, %cst_103 {dimension_numbers = #tpu.dot_dimension_numbers<[1], [0], [0], [1], [0, 0, 1, 1], [], []>} : vector<8x64xbf16>, vector<64x32xbf16>, vector<8x32xf32> -> vector<8x32xf32>
    %280 = vector.broadcast %158 : vector<1x32xf32> to vector<8x32xf32>
    %281 = arith.addf %279, %280 : vector<8x32xf32>
    %282 = arith.addf %265, %281 : vector<8x32xf32>
    %cst_104 = arith.constant dense<0.000000e+00> : vector<8xf32>
    %283 = vector.multi_reduction <add>, %282, %cst_104 [1] : vector<8x32xf32> to vector<8xf32>
    %284 = vector.shape_cast %283 : vector<8xf32> to vector<8x1xf32>
    %cst_105 = arith.constant 3.200000e+01 : f32
    %285 = vector.broadcast %cst_105 : f32 to vector<8x1xf32>
    %286 = arith.divf %284, %285 : vector<8x1xf32>
    %287 = vector.broadcast %286 : vector<8x1xf32> to vector<8x32xf32>
    %288 = arith.subf %282, %287 : vector<8x32xf32>
    %289 = arith.mulf %288, %288 : vector<8x32xf32>
    %cst_106 = arith.constant dense<0.000000e+00> : vector<8xf32>
    %290 = vector.multi_reduction <add>, %289, %cst_106 [1] : vector<8x32xf32> to vector<8xf32>
    %291 = vector.shape_cast %290 : vector<8xf32> to vector<8x1xf32>
    %cst_107 = arith.constant 3.200000e+01 : f32
    %292 = vector.broadcast %cst_107 : f32 to vector<8x1xf32>
    %293 = arith.divf %291, %292 : vector<8x1xf32>
    %cst_108 = arith.constant 9.99999974E-6 : f32
    %294 = vector.broadcast %cst_108 : f32 to vector<8x1xf32>
    %295 = arith.addf %293, %294 : vector<8x1xf32>
    %296 = math.rsqrt %295 : vector<8x1xf32>
    %297 = vector.broadcast %296 : vector<8x1xf32> to vector<8x32xf32>
    %298 = arith.mulf %288, %297 : vector<8x32xf32>
    %299 = vector.broadcast %161 : vector<1x32xf32> to vector<8x32xf32>
    %300 = arith.mulf %298, %299 : vector<8x32xf32>
    %301 = vector.broadcast %162 : vector<1x32xf32> to vector<8x32xf32>
    %302 = arith.addf %300, %301 : vector<8x32xf32>
    %c0_109 = arith.constant 0 : index
    %c0_110 = arith.constant 0 : index
    %303 = vector.load %arg11[%c0_109, %c0_110] : memref<2x32xf32, #tpu.memory_space<vmem>>, vector<2x32xf32>
    %304 = vector.extract_strided_slice %303 {offsets = [0, 0], sizes = [1, 32], strides = [1, 1]} : vector<2x32xf32> to vector<1x32xf32>
    %305 = vector.extract_strided_slice %303 {offsets = [1, 0], sizes = [1, 32], strides = [1, 1]} : vector<2x32xf32> to vector<1x32xf32>
    %cst_111 = arith.constant dense<0.000000e+00> : vector<8xf32>
    %306 = vector.multi_reduction <add>, %302, %cst_111 [1] : vector<8x32xf32> to vector<8xf32>
    %307 = vector.shape_cast %306 : vector<8xf32> to vector<8x1xf32>
    %cst_112 = arith.constant 3.200000e+01 : f32
    %308 = vector.broadcast %cst_112 : f32 to vector<8x1xf32>
    %309 = arith.divf %307, %308 : vector<8x1xf32>
    %310 = vector.broadcast %309 : vector<8x1xf32> to vector<8x32xf32>
    %311 = arith.subf %302, %310 : vector<8x32xf32>
    %312 = arith.mulf %311, %311 : vector<8x32xf32>
    %cst_113 = arith.constant dense<0.000000e+00> : vector<8xf32>
    %313 = vector.multi_reduction <add>, %312, %cst_113 [1] : vector<8x32xf32> to vector<8xf32>
    %314 = vector.shape_cast %313 : vector<8xf32> to vector<8x1xf32>
    %cst_114 = arith.constant 3.200000e+01 : f32
    %315 = vector.broadcast %cst_114 : f32 to vector<8x1xf32>
    %316 = arith.divf %314, %315 : vector<8x1xf32>
    %cst_115 = arith.constant 9.99999974E-6 : f32
    %317 = vector.broadcast %cst_115 : f32 to vector<8x1xf32>
    %318 = arith.addf %316, %317 : vector<8x1xf32>
    %319 = math.rsqrt %318 : vector<8x1xf32>
    %320 = vector.broadcast %319 : vector<8x1xf32> to vector<8x32xf32>
    %321 = arith.mulf %311, %320 : vector<8x32xf32>
    %322 = vector.broadcast %304 : vector<1x32xf32> to vector<8x32xf32>
    %323 = arith.mulf %321, %322 : vector<8x32xf32>
    %324 = vector.broadcast %305 : vector<1x32xf32> to vector<8x32xf32>
    %325 = arith.addf %323, %324 : vector<8x32xf32>
    %326 = vector.shape_cast %325 : vector<8x32xf32> to vector<1x8x32xf32>
    %c0_116 = arith.constant 0 : index
    %c0_117 = arith.constant 0 : index
    %c0_118 = arith.constant 0 : index
    %327 = vector.load %arg12[%c0_116, %c0_117, %c0_118] : memref<1x8x32xf32, #tpu.memory_space<vmem>>, vector<1x8x32xf32>
    tpu.vector_store %arg12[%c0_116, %c0_117, %c0_118], %326 {strides = array<i32>} : memref<1x8x32xf32, #tpu.memory_space<vmem>>, vector<1x8x32xf32>,
    return
  }
  func.func @transform_0(%arg0: i32) -> (i32, i32, i32) {
    %c0_i32 = arith.constant 0 : i32
    %c0_i32_0 = arith.constant 0 : i32
    %c0_i32_1 = arith.constant 0 : i32
    return %arg0, %c0_i32, %c0_i32_0 : i32, i32, i32
  }
  func.func @transform_1(%arg0: i32) -> (i32, i32) {
    %c0_i32 = arith.constant 0 : i32
    %c0_i32_0 = arith.constant 0 : i32
    %c0_i32_1 = arith.constant 0 : i32
    return %c0_i32, %c0_i32_0 : i32, i32
  }
  func.func @transform_2(%arg0: i32) -> (i32, i32, i32) {
    %c0_i32 = arith.constant 0 : i32
    %c0_i32_0 = arith.constant 0 : i32
    %c0_i32_1 = arith.constant 0 : i32
    return %arg0, %c0_i32, %c0_i32_0 : i32, i32, i32
  }
  func.func @transform_3(%arg0: i32) -> (i32, i32, i32) {
    %c0_i32 = arith.constant 0 : i32
    %c0_i32_0 = arith.constant 0 : i32
    %c0_i32_1 = arith.constant 0 : i32
    %c0_i32_2 = arith.constant 0 : i32
    return %c0_i32, %c0_i32_0, %c0_i32_1 : i32, i32, i32
  }
  func.func @transform_4(%arg0: i32) -> (i32, i32, i32) {
    %c0_i32 = arith.constant 0 : i32
    %c0_i32_0 = arith.constant 0 : i32
    %c0_i32_1 = arith.constant 0 : i32
    %c0_i32_2 = arith.constant 0 : i32
    return %c0_i32, %c0_i32_0, %c0_i32_1 : i32, i32, i32
  }
  func.func @transform_5(%arg0: i32) -> (i32, i32, i32) {
    %c0_i32 = arith.constant 0 : i32
    %c0_i32_0 = arith.constant 0 : i32
    %c0_i32_1 = arith.constant 0 : i32
    %c0_i32_2 = arith.constant 0 : i32
    return %c0_i32, %c0_i32_0, %c0_i32_1 : i32, i32, i32
  }
  func.func @transform_6(%arg0: i32) -> (i32, i32, i32) {
    %c0_i32 = arith.constant 0 : i32
    %c0_i32_0 = arith.constant 0 : i32
    %c0_i32_1 = arith.constant 0 : i32
    %c0_i32_2 = arith.constant 0 : i32
    return %c0_i32, %c0_i32_0, %c0_i32_1 : i32, i32, i32
  }
  func.func @transform_7(%arg0: i32) -> (i32, i32, i32) {
    %c0_i32 = arith.constant 0 : i32
    %c0_i32_0 = arith.constant 0 : i32
    %c0_i32_1 = arith.constant 0 : i32
    %c0_i32_2 = arith.constant 0 : i32
    return %c0_i32, %c0_i32_0, %c0_i32_1 : i32, i32, i32
  }
  func.func @transform_8(%arg0: i32) -> (i32, i32, i32) {
    %c0_i32 = arith.constant 0 : i32
    %c0_i32_0 = arith.constant 0 : i32
    %c0_i32_1 = arith.constant 0 : i32
    %c0_i32_2 = arith.constant 0 : i32
    return %c0_i32, %c0_i32_0, %c0_i32_1 : i32, i32, i32
  }
  func.func @transform_9(%arg0: i32) -> (i32, i32, i32) {
    %c0_i32 = arith.constant 0 : i32
    %c0_i32_0 = arith.constant 0 : i32
    %c0_i32_1 = arith.constant 0 : i32
    %c0_i32_2 = arith.constant 0 : i32
    return %c0_i32, %c0_i32_0, %c0_i32_1 : i32, i32, i32
  }
  func.func @transform_10(%arg0: i32) -> (i32, i32) {
    %c0_i32 = arith.constant 0 : i32
    %c0_i32_0 = arith.constant 0 : i32
    %c0_i32_1 = arith.constant 0 : i32
    return %c0_i32, %c0_i32_0 : i32, i32
  }
  func.func @transform_11(%arg0: i32) -> (i32, i32, i32) {
    %c0_i32 = arith.constant 0 : i32
    %c0_i32_0 = arith.constant 0 : i32
    %c0_i32_1 = arith.constant 0 : i32
    return %arg0, %c0_i32, %c0_i32_0 : i32, i32, i32
  }
}

</mosaic_0001>

<bundles_post_ra>
// kernel: tpu_custom_call.1
= control target key start
LH: loop header
LB: loop body
LE: loop exit
PB: predicated region body
PF: predicated region fallthrough
CT: control target
= control target key end

     0   :  { %s3595_s0 = inlined_call_operand.hbm [shape: f32[2,8,32], index: 0, kind: input, shape index: {}]   ;;  %s3596_s1 = inlined_call_operand.hbm [shape: f32[8,8], index: 1, kind: input, shape index: {}]   ;;  %s3597_s2 = inlined_call_operand.hbm [shape: f32[2,1,8], index: 2, kind: input, shape index: {}]   ;;  %s3598_s3 = inlined_call_operand.vmem [shape: bf16[2,32,96], index: 3, kind: input, shape index: {}]   ;;  %s3599_s4 = inlined_call_operand.hbm [shape: f32[2,1,96], index: 4, kind: input, shape index: {}]   ;;  %s3600_s5 = inlined_call_operand.vmem [shape: bf16[2,32,32], index: 5, kind: input, shape index: {}]   ;;  %s3601_s6 = inlined_call_operand.vmem [shape: bf16[2,32,64], index: 6, kind: input, shape index: {}]   ;;  %s3602_s7 = inlined_call_operand.hbm [shape: f32[2,1,64], index: 7, kind: input, shape index: {}]   ;;  %s3603_s8 = inlined_call_operand.vmem [shape: bf16[2,64,32], index: 8, kind: input, shape index: {}]   ;;  %s3604_s9 = inlined_call_operand.vmem [shape: f32[2,6,32], index: 9, kind: input, shape index: {}]   ;;  %s3605_s10 = inlined_call_operand.vmem [shape: f32[2,32], index: 10, kind: input, shape index: {}]   ;;  %s3606_s11 = inlined_call_operand.hbm [shape: f32[2,8,32], index: 11, kind: output, shape index: {}]  }
   0x1   :  { %3627 = sst [smem:[#allocation22_spill]] %s3595_s0 }
   0x2   :  { %3628 = sst [smem:[#allocation23_spill]] %s3596_s1 }
   0x3   :  { %3629 = sst [smem:[#allocation24_spill]] %s3606_s11 }
   0x4   :  { %16 = vsyncpa [#allocation3], 0 }
   0x5   :  { %18 = vsyncpa [#allocation3 + $0x1], 0 }
   0x6   :  { %19 = vsyncpa [#allocation6], 0 }
   0x7   :  { %20 = vsyncpa [#allocation10], 0 }
   0x8   :  { %21 = vsyncpa [#allocation4], 0 }
   0x9   :  { %23 = vsyncpa [#allocation4 + $0x1], 0  ;;  %s3000_s17 = smov 0   ;;  %s3002_s18 = smov 0  }
   0xa   :  { %s3004_s19 = smov 0   ;;  %s3006_s20 = smov 0  }
   0xb LB: > { %3630 = sst [smem:[#allocation18_spill]] %s2902_s17  ;;  %s3021_s21 = sadd.s32 4294967295, %s2914_s20   ;;  %s2914_s20 = sphi %s3006_s20, %s3669_s20   ;;  %s2910_s19 = sphi %s3004_s19, %s3673_s19   ;;  %s2906_s18 = sphi %s3002_s18, %s3672_s18   ;;  %s2902_s17 = sphi %s3000_s17, %s3671_s17  }
   0xc   : > { %s2221_s22 = sadd.s32 4294967294, %s2914_s20   ;;  %p49_p0 = scmp.ne.s32.totalorder %s2906_s18, %s2902_s17 }
   0xd   : > { %p3607_p1 = scmp.eq.s32.totalorder %s3021_s21, 0  ;;  %p294_p3 = scmp.eq.s32.totalorder %s2221_s22, 1 }
   0xe   : > { %p2222_p5 = scmp.ge.s32.totalorder %s2914_s20, 1  ;;  %p301_p7 = scmp.lt.s32.totalorder %s2914_s20, 3 }
   0xf   : > { %p3030_p4 = por %p3607_p1, %p49_p0  ;;  %p3035_p6 = por %p294_p3, %p49_p0 }
  0x10   : > { %p3040_p8 = pnand %p2222_p5, %p301_p7  ;;  %s2916_s26 = smov [#allocation5]  }
  0x11   : > { %s3631_s23 = scalar_select %p3030_p4, 1, 0 }
  0x12   : > { %s3632_s24 = scalar_select %p3035_p6, 1, 0 }
  0x13   : > { %s3634_s25 = scalar_select %p3040_p8, 1, 0 }
  0x14   : > { %3633 = sst [smem:[#allocation19_spill]] %s3632_s24  ;;  %s314_s27 = sshll.u32 %s2916_s26, 4  ;;  %s315_s27 = int_to_ptr.vmem [resolvable:$true] %s314_s27 }
  0x15   : > { %p2556_p10 = pneg %p3040_p8  ;;  %s3048_s28 = sadd.s32 1, %s2914_s20  }
  0x16   : > { %3635 = sst [smem:[#allocation20_spill]] %s3048_s28  ;;  %s33_s30 = ssub.s32 %s2914_s20, %s3048_s28 }
  0x17   : > { %p3052_p11 = pnand %p2556_p10, %p3607_p1  ;;  %p3058_p12 = scmp.eq.s32.totalorder %s33_s30, 0 }
  0x18   : > { %s36_s13 = sadd.s32 1, %s2910_s19  ;;  %p43_p13 = scmp.ne.s32.totalorder %s2910_s19, %s2906_s18 }
  0x19   : > { %s3636_s29 = scalar_select %p3052_p11, 1, 0 }
  0x1a   : > { %p3614_p0 = pneg %p3052_p11  ;;  %s2711_s14 = scalar_lea.vmem %s315_s27, 128 }
  0x1b   : > { %p2712_p3 = scmp.ne.s32.totalorder %s315_s27, %s2711_s14  ;;  %p2719_p10 = scmp.lt.s32.totalorder %s315_s27, %s315_s27 }
  0x1c   : > { %p2720_p9 = scmp.lt.s32.totalorder %s2711_s14, %s2711_s14 }
  0x1d   : > { %p2714_p5 = pnand %p2712_p3, %p3614_p0 }
  0x1e   : > { %p2721_p1 = por %p2720_p9, %p2719_p10 }
  0x1f   : > { %p2715_p7 = pneg %p2714_p5 }
  0x21   : > { %p2722_p2 = pnand %p2721_p1, %p2715_p7 }
  0x23   : > { %2725 = shalt.err (!%p2722_p2)
}
  0x24   : > { %s3638_s1 = sld [smem:[#allocation23_spill]]  ;;  %p44_p1 = scmp.eq.s32.totalorder %s2914_s20, 0 }
  0x25   : > { %s3078_s22 = scalar_select %p3058_p12, %s2910_s19, %s36_s13  }
  0x26   : > { %p3640_p2 = scmp.eq.s32.totalorder %s3021_s21, 1  ;;  %p2580_p3 = scmp.lt.s32.totalorder %s2914_s20, 2 }
  0x27   : > { %3639 = sst [smem:[#allocation21_spill]] %s3078_s22  ;;  %s369_s30 = sand.u32 1, %s2914_s20  }
  0x28   : > { %p3086_p9 = por %p3640_p2, %p43_p13  ;;  %p45_p5 = por %p44_p1, %p43_p13 }
  0x29   : > { %s3611_s14 = sand.u32 1, %s2910_s19   ;;  %s2228_s15 = sshll.u32 %s2914_s20, 7 }
  0x2a   : > { %2559 = dma.hbm_to_vmem [thread:$0]  (!%p3052_p11), %s3638_s1, 128, %s315_s27, [#allocation6]  }
  0x2b   : > { %s3641_s26 = scalar_select %p3086_p9, 1, 0 }
  0x2c   : > { %s2227_s16 = sshll.u32 %s3611_s14, 3  ;;  %s3642_s0 = sld [smem:[#allocation22_spill]] }
  0x2d   : > { %p3104_p12 = pnand %p2580_p3, %p45_p5  ;;  %s373_s1 = scalar_lea.vmem [#allocation2], %s2227_s16 }
  0x2e   : > { %s380_s22 = sshll.u32 %s373_s1, 4  ;;  %s3108_s24 = scalar_lea.sflag [#allocation3], %s369_s30  ;;  %s381_s22 = int_to_ptr.vmem [resolvable:$true] %s380_s22 }
  0x2f   : > { %p2728_p7 = pneg %p3104_p12 }
  0x32   : > { %s3102_s12 = scalar_lea.hbm %s3642_s0, %s2228_s15  ;;  %s2731_s27 = scalar_lea.hbm %s3642_s0, 256 }
  0x33   : > { %s2726_s14 = scalar_lea.hbm %s3102_s12, 128  ;;  %p2732_p2 = scmp.lt.s32.totalorder %s3102_s12, %s3642_s0 }
  0x34   : > { %p2727_p13 = scmp.ne.s32.totalorder %s3102_s12, %s2726_s14  ;;  %p2733_p3 = scmp.lt.s32.totalorder %s2731_s27, %s2726_s14 }
  0x36   : > { %p2729_p10 = pnand %p2728_p7, %p2727_p13  ;;  %p2734_p5 = por %p2733_p3, %p2732_p2 }
  0x38   : > { %p2730_p1 = pneg %p2729_p10 }
  0x3a   : > { %p2735_p0 = pnand %p2734_p5, %p2730_p1 }
  0x3c   : > { %2738 = shalt.err (!%p2735_p0)
}
  0x3d   : > { %s2739_s1 = scalar_lea.vmem %s381_s22, 128  ;;  %s2917_s30 = smov [#allocation2]  }
  0x3e   : > { %p2740_p6 = scmp.ne.s32.totalorder %s381_s22, %s2739_s1  ;;  %s2744_s16 = sshll.u32 %s2917_s30, 4  ;;  %s2745_s16 = int_to_ptr.vmem [resolvable:$false] %s2744_s16 }
  0x3f   : > { %s2746_s28 = scalar_lea.vmem %s2745_s16, 256  ;;  %p2747_p10 = scmp.lt.s32.totalorder %s381_s22, %s2745_s16 }
  0x40   : > { %p2742_p9 = pnand %p2740_p6, %p2728_p7  ;;  %p2748_p4 = scmp.lt.s32.totalorder %s2746_s28, %s2739_s1 }
  0x42   : > { %p2743_p13 = pneg %p2742_p9  ;;  %p2749_p8 = por %p2748_p4, %p2747_p10 }
  0x44   : > { %p2750_p11 = pnand %p2749_p8, %p2743_p13 }
  0x46   : > { %2753 = shalt.err (!%p2750_p11)
}
  0x47   : > { %2569 = dma.hbm_to_vmem [thread:$0]  (!%p3104_p12), %s3102_s12, 128, %s381_s22, %s3108_s24  }
  0x48   : > { %s2918_s11 = smov [#allocation8]   ;;  %p3644_p0 = scmp.ne.s32.totalorder %s3636_s29, 0 }
  0x49   : > { %s327_s17 = sshll.u32 %s2918_s11, 4  ;;  %s328_s17 = int_to_ptr.vmem [resolvable:$true] %s327_s17 }
  0x4a   : > { %s2765_s14 = scalar_lea.vmem %s328_s17, 32  ;;  %p3645_p9 = pneg %p3644_p0 }
  0x4b   : > { %p2766_p6 = scmp.ne.s32.totalorder %s328_s17, %s2765_s14  ;;  %p2773_p3 = scmp.lt.s32.totalorder %s328_s17, %s328_s17 }
  0x4c   : > { %p2774_p5 = scmp.lt.s32.totalorder %s2765_s14, %s2765_s14 }
  0x4d   : > { %p2768_p1 = pnand %p2766_p6, %p3645_p9 }
  0x4e   : > { %p2775_p4 = por %p2774_p5, %p2773_p3 }
  0x4f   : > { %p2769_p2 = pneg %p2768_p1 }
  0x51   : > { %p2776_p8 = pnand %p2775_p4, %p2769_p2 }
  0x53   : > { %2779 = shalt.err (!%p2776_p8)
}
  0x54   : > { %s2919_s15 = smov 16   ;;  %s2920_s27 = smov 1  }
  0x55   : > { %2562 = dma.hbm_to_vmem [thread:$0]  (!%p3644_p0), %s3599_s4, 32, %s328_s17, [#allocation6], %s2919_s15, %s2919_s15, %s2920_s27  }
  0x56   : > { %s2921_s1 = smov [#allocation9]   ;;  %s2229_s16 = sshll.u32 %s2914_s20, 4 }
  0x57   : > { %s346_s30 = sshll.u32 %s2921_s1, 4  ;;  %s3143_s14 = scalar_lea.hbm %s3597_s2, %s2229_s16  ;;  %s347_s30 = int_to_ptr.vmem [resolvable:$true] %s346_s30 }
  0x58   : > { %s2791_s0 = scalar_lea.vmem %s347_s30, 32  ;;  %p3646_p13 = pmov %p3645_p9 }
  0x59   : > { %p2792_p11 = scmp.ne.s32.totalorder %s347_s30, %s2791_s0  ;;  %p2799_p9 = scmp.lt.s32.totalorder %s347_s30, %s347_s30 }
  0x5a   : > { %p2800_p1 = scmp.lt.s32.totalorder %s2791_s0, %s2791_s0 }
  0x5b   : > { %p2794_p10 = pnand %p2792_p11, %p3646_p13 }
  0x5c   : > { %p2801_p2 = por %p2800_p1, %p2799_p9 }
  0x5d   : > { %p2795_p6 = pneg %p2794_p10 }
  0x5f   : > { %p2802_p3 = pnand %p2801_p2, %p2795_p6 }
  0x61   : > { %2805 = shalt.err (!%p2802_p3)
}
  0x62   : > { %2565 = dma.hbm_to_vmem [thread:$0]  (!%p3644_p0), %s3602_s7, 32, %s347_s30, [#allocation10], %s2919_s15, %s2919_s15, %s2920_s27  }
  0x63   : > { %s3647_s12 = sand.u32 1, %s2910_s19   ;;  %s2806_s28 = scalar_lea.hbm %s3143_s14, 16 }
  0x64   : > { %s390_s1 = scalar_lea.vmem [#allocation7], %s3647_s12  ;;  %p2807_p5 = scmp.ne.s32.totalorder %s3143_s14, %s2806_s28 }
  0x65   : > { %s397_s16 = sshll.u32 %s390_s1, 4  ;;  %s2811_s11 = scalar_lea.hbm %s3597_s2, 32  ;;  %s398_s16 = int_to_ptr.vmem [resolvable:$true] %s397_s16 }
  0x66   : > { %p2809_p4 = pnand %p2807_p5, %p2728_p7  ;;  %p2812_p11 = scmp.lt.s32.totalorder %s3143_s14, %s3597_s2 }
  0x67   : > { %p2813_p13 = scmp.lt.s32.totalorder %s2811_s11, %s2806_s28 }
  0x68   : > { %p2810_p8 = pneg %p2809_p4 }
  0x69   : > { %p2814_p0 = por %p2813_p13, %p2812_p11 }
  0x6b   : > { %p2815_p10 = pnand %p2814_p0, %p2810_p8 }
  0x6d   : > { %2818 = shalt.err (!%p2815_p10)
}
  0x6e   : > { %s2819_s15 = scalar_lea.vmem %s398_s16, 16  ;;  %s2922_s27 = smov [#allocation7]  }
  0x6f   : > { %p2820_p6 = scmp.ne.s32.totalorder %s398_s16, %s2819_s15  ;;  %s2824_s30 = sshll.u32 %s2922_s27, 4  ;;  %s2825_s30 = int_to_ptr.vmem [resolvable:$false] %s2824_s30 }
  0x70   : > { %s2826_s12 = scalar_lea.vmem %s2825_s30, 32  ;;  %p2827_p2 = scmp.lt.s32.totalorder %s398_s16, %s2825_s30 }
  0x71   : > { %p2822_p9 = pnand %p2820_p6, %p2728_p7  ;;  %p2828_p3 = scmp.lt.s32.totalorder %s2826_s12, %s2819_s15 }
  0x73   : > { %p2823_p1 = pneg %p2822_p9  ;;  %p2829_p5 = por %p2828_p3, %p2827_p2 }
  0x75   : > { %p2830_p4 = pnand %p2829_p5, %p2823_p1 }
  0x77   : > { %2833 = shalt.err (!%p2830_p4)
}
  0x78   : > { %2572 = dma.hbm_to_vmem [thread:$0]  (!%p3104_p12), %s3143_s14, 16, %s398_s16, %s3108_s24  }
  0x79   : > { %p3648_p8 = scmp.ne.s32.totalorder %s3634_s25, 0 }
  0x7a   : > { %s408_s1 = sand.u32 (!%p3648_p8), 1, %s3021_s21   ;;  %s3178_s28 = sand.u32 (!%p3648_p8), 1, %s2906_s18  }
  0x7b   : > { %406 = sbr.rel (%p3648_p8) target bundleno = 5298 (0x14b2), region = 64  ;;  %s3620_s0 = sshll.u32 (!%p3648_p8), %s3178_s28, 3 }
  0x7c   : > { %s409_s29 = scalar_lea.sflag (!%p3648_p8), [#allocation3], %s408_s1  ;;  %s412_s11 = scalar_lea.vmem (!%p3648_p8), [#allocation2], %s3620_s0 }
  0x7d   : > { %p3649_p7 = scmp.ne.s32.totalorder (!%p3648_p8), %s3631_s23, 0 }
  0x80   : > { %2877 = dma.done.wait (%p3649_p7), %s409_s29, 128  }
  0x81   : > { %2879 = vsyncadd (%p3649_p7), %s409_s29, 4294967168  ;;  %p3650_p12 = scmp.eq.s32.totalorder %s3021_s21, 0 }
  0x83   : > { %2881 = dma.done.wait (%p3650_p12), [#allocation6], 128   ;;  %p3651_p11 = pmov %p3650_p12 }
  0x84   : > { %s424_s24 = scalar_lea.vmem [#allocation7], %s3178_s28 }
  0x85   : > { %2883 = vsyncadd (%p3651_p11), [#allocation6], 4294967168 }
  0x86   : > { %2885 = dma.done.wait (%p3649_p7), %s409_s29, 16  }
  0x87   : > { %2887 = vsyncadd (%p3649_p7), %s409_s29, 4294967280  ;;  %p3652_p13 = pmov %p3651_p11 }
  0x88   : > { %p3653_p0 = pmov %p3651_p11 }
  0x89   : > { %2889 = dma.done.wait (%p3652_p13), [#allocation6], 32  }
  0x8a   : > { %2891 = vsyncadd (%p3653_p0), [#allocation6], 4294967264  ;;  %p3654_p10 = pmov %p3653_p0 }
  0x8b   : > { %p3655_p6 = pmov %p3653_p0 }
  0x8c   : > { %2893 = dma.done.wait (%p3654_p10), [#allocation10], 32  }
  0x8d   : > { %2895 = vsyncadd (%p3655_p6), [#allocation10], 4294967264  ;;  %v2923_v0 = vmov 0.0   ;;  %vm2924_vm0 = vmmov 0   ;;  %v2638_v1 = vld [vmem:[%s3598_s3 + $0x8] sm:$0xff]   ;;  %v2639_v2 = vld [vmem:[%s3598_s3] sm:$0xff]  }
  0x8e   : > { %2370 = vmatprep.subr.bf16.mxu1 %v2923_v0  ;;  %2374 = vmatprep.mubr.msk.bf16.mxu1 %vm2924_vm0, %v2923_v0  ;;  %v3216_v3 = vld [vmem:[%s412_s11] sm:$0xff]  ;;  %vm511_vm1 = vcmask 261120   ;;  %v2237_v5 = vld [vmem:[#allocation8] ss:$0 sm:$0xff]  ;;  %s2925_s16 = smov 120   ;;  %s2926_s17 = smov 96  }
  0x8f   : > { %2384 = vmatprep.subr.bf16.mxu0 %v2923_v0  ;;  %2386 = vmatprep.mubr.msk.bf16.mxu0 %vm2924_vm0, %v2923_v0  ;;  %v487_v4 = vpack.c.bf16 %v3216_v3, %v3216_v3  ;;  %s2927_s22 = smov 80   ;;  %s2928_s15 = smov 88   ;;  %vm559_vm2 = vcmask 64512   ;;  %v476_v23 = vld [vmem:[#allocation5] sm:$0xff]  ;;  %v2236_v24 = vld [vmem:[%s424_s24] ss:$0 sm:$0xff] }
  0x90   : > { %2371 = vmatpush3.bf16.msra.mxu1 %v2638_v1  ;;  %s2929_s27 = smov 72   ;;  %s2930_s30 = smov 112   ;;  %v3264_v25 = vadd.f32 %v2236_v24, %v476_v23  ;;  %vm623_vm3 = vcmask 1043456   ;;  %vm1010_vm4 = vcmask 130048   ;;  %vm1012_vm5 = vcmask 195584  }
  0x91   : > { %2372 = vmatprep.subr.bf16.mxu1 %v2923_v0  ;;  %s2931_s12 = smov 104   ;;  %s2932_s1 = smov 56   ;;  %vm1208_vm6 = vcmask 523264  }
  0x92   : > { %s3626_s29 = smov 64   ;;  %s3625_s11 = smov 40  }
  0x93   : > { %s3621_s24 = smov 48   ;;  %s3624_s23 = smov 8  }
  0x94   : > { %2373 = vmatpush3.bf16.msra.mxu1 %v2639_v2  ;;  %s3622_s25 = smov 24   ;;  %p3664_p1 = scmp.ne.s32.totalorder %s3641_s26, 0 }
  0x95   : > { %2378 = vmatprep.subr.bf16.mxu1 %v2923_v0 }
  0x97   : > { %2375 = vmatmul.mubr.msk.bf16.vlgmr.msra.gmra.mxu1 %vm511_vm1, %v487_v4 }
  0x98   : > { %2380 = vmatprep.mubr.msk.bf16.mxu1 %vm2924_vm0, %v2923_v0 }
 0x157   : > { %v549_v6 = vpop.f32.mrf.mxu1 }
 0x158   : > { %v550_v7 = vadd.f32 %v2237_v5, %v549_v6 }
 0x159   : > { %v2376_v8 = vpop.f32.mrf.mxu1 }
 0x15a   : > { %v3225_v9 = vpack.c.bf16 %v550_v7, %v550_v7 }
 0x15b   : > { %v552_v10 = vpop.f32.mrf.mxu1 }
 0x15c   : > { %667 = vrot.lane.b32.xlu1 %v3225_v9, %s2925_s16  ;;  %557 = vrot.lane.b32.xlu0 %v3225_v9, %s2926_s17 }
 0x15d   : > { %v2377_v11 = vpop.f32.mrf.mxu1 }
 0x160   : > { %779 = vrot.lane.b32.xlu1 %v3225_v9, %s2927_s22  ;;  %669 = vrot.lane.b32.xlu0 %v3225_v9, %s2928_s15 }
 0x164   : > { %889 = vrot.lane.b32.xlu1 %v3225_v9, %s2929_s27  ;;  %777 = vrot.lane.b32.xlu0 %v3225_v9, %s2930_s30 }
 0x168   : > { %887 = vrot.lane.b32.xlu0 %v3225_v9, %s2931_s12 }
 0x1ce   : > { %v558_v12 = vpop.permute.xlu0 %557  ;;  %v668_v15 = vpop.permute.xlu1 %667 }
 0x1cf   : > { %v564_v13 = vsel %vm559_vm2, %v558_v12, 0 }
 0x1d0   : > { %2379 = vmatpush3.bf16.xpose.msra.mxu1 %v564_v13 }
 0x1d1   : > { %2390 = vmatprep.subr.bf16.mxu1 %v2923_v0 }
 0x1d2   : > { %v670_v14 = vpop.permute.xlu0 %669  ;;  %v780_v17 = vpop.permute.xlu1 %779 }
 0x1d3   : > { %v675_v16 = vsel %vm559_vm2, %v670_v14, 0  ;;  %v785_v18 = vsel %vm559_vm2, %v780_v17, 0 }
 0x1d6   : > { %v890_v19 = vpop.permute.xlu1 %889  ;;  %v778_v20 = vpop.permute.xlu0 %777 }
 0x1d7   : > { %2381 = vmatmul.mubr.msk.bf16.vlgmr.msra.gmra.mxu1 %vm559_vm2, %v3225_v9  ;;  %v895_v21 = vsel %vm559_vm2, %v890_v19, 0 }
 0x1d8   : > { %2391 = vmatpush3.bf16.xpose.msra.mxu1 %v675_v16  ;;  %2392 = vmatprep.mubr.msk.bf16.mxu1 %vm2924_vm0, %v2923_v0 }
 0x1d9   : > { %2402 = vmatprep.subr.bf16.mxu1 %v2923_v0 }
 0x1da   : > { %v888_v22 = vpop.permute.xlu0 %887 }
 0x1df   : > { %2393 = vmatmul.mubr.msk.bf16.vlgmr.msra.gmra.mxu1 %vm559_vm2, %v668_v15 }
 0x1e0   : > { %2403 = vmatpush3.bf16.xpose.msra.mxu1 %v785_v18  ;;  %2404 = vmatprep.mubr.msk.bf16.mxu1 %vm2924_vm0, %v2923_v0 }
 0x1e1   : > { %2414 = vmatprep.subr.bf16.mxu1 %v2923_v0 }
 0x1e7   : > { %2405 = vmatmul.mubr.msk.bf16.vlgmr.msra.gmra.mxu1 %vm559_vm2, %v778_v20 }
 0x1e8   : > { %2415 = vmatpush3.bf16.xpose.msra.mxu1 %v895_v21  ;;  %2416 = vmatprep.mubr.msk.bf16.mxu1 %vm2924_vm0, %v2923_v0 }
 0x1e9   : > { %2426 = vmatprep.subr.bf16.mxu1 %v2923_v0 }
 0x1ef   : > { %2417 = vmatmul.mubr.msk.bf16.vlgmr.msra.gmra.mxu1 %vm559_vm2, %v888_v22 }
 0x1f0   : > { %2430 = vmatprep.mubr.msk.bf16.mxu1 %vm2924_vm0, %v2923_v0 }
 0x297   : > { %v600_v26 = vpop.f32.mrf.mxu1 }
 0x298   : > { %v601_v27 = vadd.f32 %v600_v26, %v3264_v25 }
 0x299   : > { %v2382_v28 = vpop.f32.mrf.mxu1 }
 0x29a   : > { %v606_v29 = vsel %vm559_vm2, %v601_v27, -inf }
 0x29b   : > { %v603_v30 = vpop.f32.mrf.mxu1  ;;  %607 = vmax.xlane.f32.xlu1 %v606_v29 }
 0x29d   : > { %v2383_v31 = vpop.f32.mrf.mxu1 }
 0x29f   : > { %v711_v32 = vpop.f32.mrf.mxu1 }
 0x2a0   : > { %v712_v33 = vadd.f32 %v711_v32, %v3264_v25 }
 0x2a1   : > { %v2394_v34 = vpop.f32.mrf.mxu1 }
 0x2a2   : > { %v717_v35 = vsel %vm559_vm2, %v712_v33, -inf }
 0x2a3   : > { %v714_v36 = vpop.f32.mrf.mxu1  ;;  %718 = vmax.xlane.f32.xlu0 %v717_v35 }
 0x2a5   : > { %v2395_v37 = vpop.f32.mrf.mxu1 }
 0x2a7   : > { %v821_v38 = vpop.f32.mrf.mxu1 }
 0x2a8   : > { %v822_v39 = vadd.f32 %v821_v38, %v3264_v25 }
 0x2a9   : > { %v2406_v40 = vpop.f32.mrf.mxu1 }
 0x2aa   : > { %v827_v41 = vsel %vm559_vm2, %v822_v39, -inf }
 0x2ab   : > { %v824_v42 = vpop.f32.mrf.mxu1  ;;  %828 = vmax.xlane.f32.xlu0 %v827_v41  ;;  %v2640_v41 = vld [vmem:[%s3600_s5 + $0x8] sm:$0xff]  }
 0x2ac   : > { %2427 = vmatpush3.bf16.msra.mxu1 %v2640_v41  ;;  %v2641_v42 = vld [vmem:[%s3600_s5] sm:$0xff]  }
 0x2ad   : > { %v2407_v43 = vpop.f32.mrf.mxu1  ;;  %2428 = vmatprep.subr.bf16.mxu1 %v2923_v0 }
 0x2af   : > { %v931_v44 = vpop.f32.mrf.mxu1 }
 0x2b0   : > { %v932_v45 = vadd.f32 %v931_v44, %v3264_v25  ;;  %2429 = vmatpush3.bf16.msra.mxu1 %v2641_v42 }
 0x2b1   : > { %v2418_v46 = vpop.f32.mrf.mxu1  ;;  %2442 = vmatprep.subr.bf16.mxu1 %v2923_v0 }
 0x2b2   : > { %v937_v47 = vsel %vm559_vm2, %v932_v45, -inf }
 0x2b3   : > { %v934_v48 = vpop.f32.mrf.mxu1  ;;  %938 = vmax.xlane.f32.xlu1 %v937_v47 }
 0x2b5   : > { %v2419_v49 = vpop.f32.mrf.mxu1 }
 0x324   : > { %v608_v50 = vpop.xlane.xlu1 %607 }
 0x325   : > { %v609_v51 = vsub.f32 %v601_v27, %v608_v50 }
 0x327   : > { %v610_v52 = vmul.f32 1.442695, %v609_v51 }
 0x329   : > { %2658 = vpow2.f32 %v610_v52 }
 0x32c   : > { %v719_v53 = vpop.xlane.xlu0 %718 }
 0x32d   : > { %v720_v54 = vsub.f32 %v712_v33, %v719_v53 }
 0x32f   : > { %v721_v55 = vmul.f32 1.442695, %v720_v54 }
 0x331   : > { %2660 = vpow2.f32 %v721_v55 }
 0x334   : > { %v829_v56 = vpop.xlane.xlu0 %828 }
 0x335   : > { %v830_v57 = vsub.f32 %v822_v39, %v829_v56 }
 0x336   : > { %v2659_v58 = vpop.eup %2658 }
 0x337   : > { %v831_v59 = vmul.f32 1.442695, %v830_v57  ;;  %v612_v60 = vsel %vm559_vm2, %v2659_v58, 0.0 }
 0x338   : > { %613 = vadd.xlane.f32.xlu0 %v612_v60 }
 0x339   : > { %2662 = vpow2.f32 %v831_v59 }
 0x33c   : > { %v939_v2 = vpop.xlane.xlu1 %938 }
 0x33d   : > { %v940_v4 = vsub.f32 %v932_v45, %v939_v2 }
 0x33e   : > { %v2661_v61 = vpop.eup %2660 }
 0x33f   : > { %v723_v62 = vsel %vm559_vm2, %v2661_v61, 0.0  ;;  %v941_v5 = vmul.f32 1.442695, %v940_v4 }
 0x340   : > { %724 = vadd.xlane.f32.xlu1 %v723_v62 }
 0x341   : > { %2664 = vpow2.f32 %v941_v5 }
 0x346   : > { %v2663_v63 = vpop.eup %2662 }
 0x347   : > { %v833_v1 = vsel %vm559_vm2, %v2663_v63, 0.0 }
 0x348   : > { %834 = vadd.xlane.f32.xlu0 %v833_v1 }
 0x34e   : > { %v2665_v6 = vpop.eup %2664 }
 0x34f   : > { %v943_v7 = vsel %vm559_vm2, %v2665_v6, 0.0 }
 0x351   : > { %729 = vrot.lane.b32.xlu1 %v3225_v9, %s2932_s1 }
 0x35e   : > { %618 = vrot.lane.b32.xlu0 %v3225_v9, %s3626_s29  ;;  %s3660_s29 = smov 16  }
 0x362   : > { %949 = vrot.lane.b32.xlu0 %v3225_v9, %s3625_s11  ;;  %s3661_s11 = smov 24  }
 0x375   : > { %944 = vadd.xlane.f32.xlu1 %v943_v7 }
 0x386   : > { %839 = vrot.lane.b32.xlu1 %v3225_v9, %s3621_s24  ;;  %s3623_s24 = smov 16  }
 0x3c1   : > { %v614_v8 = vpop.xlane.xlu0 %613 }
 0x3c2   : > { %2666 = vrcp.f32 %v614_v8 }
 0x3c9   : > { %v725_v10 = vpop.xlane.xlu1 %724 }
 0x3ca   : > { %2668 = vrcp.f32 %v725_v10 }
 0x3cd   : > { %v730_v16 = vpop.permute.xlu1 %729 }
 0x3ce   : > { %v735_v19 = vsel %vm623_vm3, %v730_v16, 0  ;;  %v2645_v16 = vld [vmem:[%s3603_s8 + $0x10] sm:$0xff]  }
 0x3cf   : > { %v2667_v11 = vpop.eup %2666 }
 0x3d0   : > { %v616_v13 = vmul.f32 %v2667_v11, %v2659_v58  ;;  %v1019_v58 = vlaneseq }
 0x3d1   : > { %v835_v12 = vpop.xlane.xlu0 %834 }
 0x3d2   : > { %v617_v17 = vpack.c.bf16 %v616_v13, %v616_v13  ;;  %2670 = vrcp.f32 %v835_v12  ;;  %v3323_v59 = vshrl.u32 %v1019_v58, 7 }
 0x3d4   : > { %v3326_v60 = vsub.s32 0, %v3323_v59  ;;  %v1268_v58 = vsub.s32 4, %v3323_v59 }
 0x3d5   : > { %v619_v14 = vpop.permute.xlu0 %618 }
 0x3d6   : > { %v625_v15 = vsel %vm623_vm3, %v619_v14, 0  ;;  %v2642_v14 = vld [vmem:[%s3601_s6 + $0x8] sm:$0xff]  }
 0x3d7   : > { %2385 = vmatpush3.bf16.msra.mxu0 %v625_v15  ;;  %v2669_v18 = vpop.eup %2668  ;;  %v2644_v15 = vld [vmem:[%s3603_s8 + $0x18] sm:$0xff]  }
 0x3d8   : > { %2396 = vmatprep.subr.bf16.mxu0 %v2923_v0  ;;  %v727_v9 = vmul.f32 %v2669_v18, %v2661_v61  ;;  %v3331_v61 = vld [vmem:[%s3604_s9] sm:$0x3f] }
 0x3d9   : > { %v950_v27 = vpop.permute.xlu0 %949  ;;  %v1022_v62 = vrot.slane %v3331_v61, %v3326_v60 }
 0x3da   : > { %2387 = vmatmul.mubr.msk.bf16.vlgmr.msra.gmra.mxu0 %vm559_vm2, %v617_v17  ;;  %v728_v20 = vpack.c.bf16 %v727_v9, %v727_v9  ;;  %v955_v29 = vsel %vm623_vm3, %v950_v27, 0  ;;  %v1095_v9 = vsub.s32 2, %v3323_v59 }
 0x3db   : > { %2397 = vmatpush3.bf16.msra.mxu0 %v735_v19  ;;  %2398 = vmatprep.mubr.msk.bf16.mxu0 %vm2924_vm0, %v2923_v0 }
 0x3dc   : > { %2408 = vmatprep.subr.bf16.mxu0 %v2923_v0 }
 0x3df   : > { %v2671_v21 = vpop.eup %2670 }
 0x3e0   : > { %v837_v23 = vmul.f32 %v2671_v21, %v2663_v63  ;;  %v1096_v21 = vrot.slane %v3331_v61, %v1095_v9 }
 0x3e2   : > { %2399 = vmatmul.mubr.msk.bf16.vlgmr.msra.gmra.mxu0 %vm559_vm2, %v728_v20  ;;  %v838_v28 = vpack.c.bf16 %v837_v23, %v837_v23  ;;  %v1100_v20 = vsub.s32 3, %v3323_v59 }
 0x3e3   : > { %2410 = vmatprep.mubr.msk.bf16.mxu0 %vm2924_vm0, %v2923_v0 }
 0x3fe   : > { %v945_v22 = vpop.xlane.xlu1 %944 }
 0x3ff   : > { %2672 = vrcp.f32 %v945_v22 }
 0x402   : > { %v840_v24 = vpop.permute.xlu1 %839 }
 0x403   : > { %v845_v26 = vsel %vm623_vm3, %v840_v24, 0  ;;  %v1101_v24 = vrot.slane %v3331_v61, %v1100_v20 }
 0x404   : > { %2409 = vmatpush3.bf16.msra.mxu0 %v845_v26 }
 0x405   : > { %2420 = vmatprep.subr.bf16.mxu0 %v2923_v0 }
 0x407   : > { %2411 = vmatmul.mubr.msk.bf16.vlgmr.msra.gmra.mxu0 %vm559_vm2, %v838_v28 }
 0x408   : > { %2421 = vmatpush3.bf16.msra.mxu0 %v955_v29  ;;  %2422 = vmatprep.mubr.msk.bf16.mxu0 %vm2924_vm0, %v2923_v0  ;;  %v2646_v29 = vld [vmem:[%s3603_s8 + $0x8] sm:$0xff]  }
 0x409   : > { %2434 = vmatprep.subr.bf16.mxu0 %v2923_v0 }
 0x40c   : > { %v2673_v30 = vpop.eup %2672 }
 0x40d   : > { %v947_v31 = vmul.f32 %v2673_v30, %v2665_v6  ;;  %v2647_v30 = vld [vmem:[%s3603_s8] sm:$0xff]  }
 0x40f   : > { %v948_v32 = vpack.c.bf16 %v947_v31, %v947_v31  ;;  %v2252_v31 = vld [vmem:[#allocation9] ss:$0 sm:$0xff] }
 0x411   : > { %2423 = vmatmul.mubr.msk.bf16.vlgmr.msra.gmra.mxu0 %vm559_vm2, %v948_v32 }
 0x412   : > { %2438 = vmatprep.mubr.msk.bf16.mxu0 %vm2924_vm0, %v2923_v0  ;;  %2435 = vmatpush3.bf16.msra.mxu0 %v2642_v14 }
 0x413   : > { %2436 = vmatprep.subr.bf16.mxu0 %v2923_v0 }
 0x49a   : > { %v661_v33 = vpop.f32.mrf.mxu0 }
 0x49c   : > { %v2388_v34 = vpop.f32.mrf.mxu0 }
 0x49e   : > { %v664_v35 = vpop.f32.mrf.mxu0 }
 0x4a0   : > { %v2389_v36 = vpop.f32.mrf.mxu0 }
 0x4a2   : > { %v771_v37 = vpop.f32.mrf.mxu0 }
 0x4a3   : > { %998 = vrot.lane.b32.xlu1 %v771_v37, %s3624_s23  ;;  %s3662_s23 = sshll.u32 %s3178_s28, 3 }
 0x4a4   : > { %v2400_v38 = vpop.f32.mrf.mxu0 }
 0x4a6   : > { %v774_v39 = vpop.f32.mrf.mxu0 }
 0x4a7   : > { %v3377_v39 = vsub.s32 1, %v3323_v59 }
 0x4a8   : > { %v2401_v40 = vpop.f32.mrf.mxu0 }
 0x4a9   : > { %v1183_v40 = vrot.slane %v3331_v61, %v3377_v39 }
 0x4c7   : > { %v881_v43 = vpop.f32.mrf.mxu0 }
 0x4c8   : > { %1002 = vrot.lane.b32.xlu0 %v881_v43, %s3623_s24  ;;  %s2307_s24 = sshll.u32 %s3021_s21, 7 }
 0x4c9   : > { %v2412_v44 = vpop.f32.mrf.mxu0 }
 0x4cb   : > { %v884_v45 = vpop.f32.mrf.mxu0 }
 0x4cd   : > { %v2413_v46 = vpop.f32.mrf.mxu0 }
 0x4d1   : > { %v991_v47 = vpop.f32.mrf.mxu0 }
 0x4d2   : > { %1006 = vrot.lane.b32.xlu1 %v991_v47, %s3622_s25  ;;  %s474_s25 = scalar_lea.vmem [#allocation11], %s3662_s23 }
 0x4d3   : > { %v2424_v48 = vpop.f32.mrf.mxu0  ;;  %s2105_s14 = sshll.u32 %s474_s25, 4  ;;  %s2106_s14 = int_to_ptr.vmem [resolvable:$true] %s2105_s14 }
 0x4d5   : > { %v994_v49 = vpop.f32.mrf.mxu0 }
 0x4d7   : > { %v2425_v50 = vpop.f32.mrf.mxu0 }
 0x515   : > { %v999_v51 = vpop.permute.xlu1 %998 }
 0x516   : > { %v1009_v53 = vsel %vm559_vm2, %v661_v33, %v999_v51 }
 0x53a   : > { %v1003_v52 = vpop.permute.xlu0 %1002 }
 0x53b   : > { %v1011_v54 = vsel %vm1010_vm4, %v1009_v53, %v1003_v52  ;;  %v2648_v53 = vld [vmem:[%s3598_s3 + $0x18] sm:$0xff]  }
 0x544   : > { %v1007_v55 = vpop.permute.xlu1 %1006 }
 0x545   : > { %v1013_v56 = vsel %vm1012_vm5, %v1011_v54, %v1007_v55  ;;  %v2649_v54 = vld [vmem:[%s3598_s3 + $0x10] sm:$0xff]  }
 0x546   : > { %v1014_v57 = vpack.c.bf16 %v1013_v56, %v1013_v56 }
 0x548   : > { %2431 = vmatmul.mubr.msk.bf16.vlgmr.msra.gmra.mxu1 %vm511_vm1, %v1014_v57 }
 0x549   : > { %2450 = vmatprep.mubr.msk.bf16.mxu1 %vm2924_vm0, %v2923_v0  ;;  %2443 = vmatpush3.bf16.msra.mxu1 %v2644_v15 }
 0x54a   : > { %2444 = vmatprep.subr.bf16.mxu1 %v2923_v0 }
 0x54d   : > { %2445 = vmatpush3.bf16.msra.mxu1 %v2645_v16 }
 0x54e   : > { %2446 = vmatprep.subr.bf16.mxu1 %v2923_v0 }
 0x551   : > { %2447 = vmatpush3.bf16.msra.mxu1 %v2646_v29 }
 0x552   : > { %2448 = vmatprep.subr.bf16.mxu1 %v2923_v0 }
 0x555   : > { %2449 = vmatpush3.bf16.msra.mxu1 %v2647_v30 }
 0x556   : > { %2468 = vmatprep.subr.bf16.mxu1 %v2923_v0 }
 0x608   : > { %v1072_v63 = vpop.f32.mrf.mxu1 }
 0x609   : > { %v1073_v1 = vadd.f32 %v1072_v63, %v1022_v62  ;;  %v1273_v62 = vsub.s32 5, %v3323_v59  ;;  %v1269_v63 = vrot.slane %v3331_v61, %v1268_v58 }
 0x60a   : > { %v2432_v2 = vpop.f32.mrf.mxu1 }
 0x60b   : > { %v1078_v4 = vadd.f32 %v1073_v1, %v3216_v3  ;;  %v2643_v3 = vld [vmem:[%s3601_s6] sm:$0xff]  }
 0x60c   : > { %v1075_v5 = vpop.f32.mrf.mxu1  ;;  %2437 = vmatpush3.bf16.msra.mxu0 %v2643_v3 }
 0x60d   : > { %v1079_v6 = vsel %vm511_vm1, %v1078_v4, 0.0  ;;  %2454 = vmatprep.subr.bf16.mxu0 %v2923_v0 }
 0x60e   : > { %1080 = vadd.xlane.f32.xlu0 %v1079_v6  ;;  %v2433_v7 = vpop.f32.mrf.mxu1 }
 0x697   : > { %v1081_v8 = vpop.xlane.xlu0 %1080 }
 0x698   : > { %v1083_v10 = vmul.f32 0.03125, %v1081_v8  ;;  %v2266_v8 = vld [vmem:[#allocation8 + $0x1] ss:$0 sm:$0xff] }
 0x69a   : > { %v1084_v11 = vsub.f32 %v1078_v4, %v1083_v10  ;;  %v1274_v4 = vrot.slane %v3331_v61, %v1273_v62 }
 0x69c   : > { %v1085_v12 = vmul.f32 %v1084_v11, %v1084_v11 }
 0x69e   : > { %v1086_v13 = vsel %vm511_vm1, %v1085_v12, 0.0 }
 0x69f   : > { %1087 = vadd.xlane.f32.xlu1 %v1086_v13 }
 0x728   : > { %v1088_v17 = vpop.xlane.xlu1 %1087 }
 0x729   : > { %v1089_v18 = vmul.f32 0.03125, %v1088_v17 }
 0x72b   : > { %v1090_v19 = vadd.f32 1e-05, %v1089_v18 }
 0x72d   : > { %2674 = vrsqrt.f32 %v1090_v19 }
 0x73a   : > { %v2675_v22 = vpop.eup %2674 }
 0x73b   : > { %v1092_v23 = vmul.f32 %v2675_v22, %v1084_v11 }
 0x73d   : > { %v1097_v26 = vmul.f32 %v1096_v21, %v1092_v23 }
 0x73f   : > { %v1102_v27 = vadd.f32 %v1101_v24, %v1097_v26 }
 0x741   : > { %v1103_v28 = vpack.c.bf16 %v1102_v27, %v1102_v27 }
 0x743   : > { %2439 = vmatmul.mubr.msk.bf16.vlgmr.msra.gmra.mxu0 %vm511_vm1, %v1103_v28 }
 0x744   : > { %2458 = vmatprep.mubr.msk.bf16.mxu0 %vm2924_vm0, %v2923_v0  ;;  %2455 = vmatpush3.bf16.msra.mxu0 %v2648_v53 }
 0x745   : > { %2456 = vmatprep.subr.bf16.mxu0 %v2923_v0 }
 0x748   : > { %2457 = vmatpush3.bf16.msra.mxu0 %v2649_v54 }
 0x749   : > { %2462 = vmatprep.subr.bf16.mxu0 %v2923_v0 }
 0x803   : > { %v1164_v32 = vpop.f32.mrf.mxu0 }
 0x804   : > { %v1165_v33 = vadd.f32 %v2252_v31, %v1164_v32 }
 0x805   : > { %v2440_v34 = vpop.f32.mrf.mxu0 }
 0x806   : > { %v1170_v35 = vmax.f32 %v1165_v33, 0.0 }
 0x807   : > { %v1167_v36 = vpop.f32.mrf.mxu0 }
 0x808   : > { %v1171_v37 = vpack.c.bf16 %v1170_v35, %v1170_v35 }
 0x809   : > { %v2441_v38 = vpop.f32.mrf.mxu0 }
 0x80a   : > { %2451 = vmatmul.mubr.msk.bf16.vlgmr.msra.gmra.mxu1 %vm1208_vm6, %v1171_v37 }
 0x80b   : > { %2470 = vmatprep.mubr.msk.bf16.mxu1 %vm2924_vm0, %v2923_v0 }
 0x8ca   : > { %v1246_v41 = vpop.f32.mrf.mxu1 }
 0x8cb   : > { %v1247_v42 = vadd.f32 %v1246_v41, %v1183_v40 }
 0x8cc   : > { %v2452_v43 = vpop.f32.mrf.mxu1 }
 0x8cd   : > { %v1252_v44 = vadd.f32 %v1247_v42, %v1102_v27 }
 0x8ce   : > { %v1249_v45 = vpop.f32.mrf.mxu1 }
 0x8cf   : > { %v1253_v46 = vsel %vm511_vm1, %v1252_v44, 0.0 }
 0x8d0   : > { %1254 = vadd.xlane.f32.xlu0 %v1253_v46  ;;  %v2453_v47 = vpop.f32.mrf.mxu1 }
 0x959   : > { %v1255_v48 = vpop.xlane.xlu0 %1254 }
 0x95a   : > { %v1256_v49 = vmul.f32 0.03125, %v1255_v48 }
 0x95c   : > { %v1257_v50 = vsub.f32 %v1252_v44, %v1256_v49 }
 0x95e   : > { %v1258_v51 = vmul.f32 %v1257_v50, %v1257_v50 }
 0x960   : > { %v1259_v52 = vsel %vm511_vm1, %v1258_v51, 0.0 }
 0x961   : > { %1260 = vadd.xlane.f32.xlu0 %v1259_v52 }
 0x9ea   : > { %v1261_v55 = vpop.xlane.xlu0 %1260 }
 0x9eb   : > { %v1262_v56 = vmul.f32 0.03125, %v1261_v55 }
 0x9ed   : > { %v1263_v57 = vadd.f32 1e-05, %v1262_v56 }
 0x9ef   : > { %2676 = vrsqrt.f32 %v1263_v57 }
 0x9fc   : > { %v2677_v1 = vpop.eup %2676 }
 0x9fd   : > { %v1265_v2 = vmul.f32 %v2677_v1, %v1257_v50 }
 0x9ff   : > { %v1270_v5 = vmul.f32 %v1269_v63, %v1265_v2 }
 0xa01   : > { %v3399_v6 = vadd.f32 %v1274_v4, %v1270_v5 }
 0xa03   : > { %v1278_v7 = vpack.c.bf16 %v3399_v6, %v3399_v6 }
 0xa05   : > { %2459 = vmatmul.mubr.msk.bf16.vlgmr.msra.gmra.mxu0 %vm511_vm1, %v1278_v7 }
 0xa06   : > { %2464 = vmatprep.mubr.msk.bf16.mxu0 %vm2924_vm0, %v2923_v0 }
 0xac5   : > { %v1341_v10 = vpop.f32.mrf.mxu0 }
 0xac6   : > { %v1342_v11 = vadd.f32 %v2266_v8, %v1341_v10 }
 0xac7   : > { %v2460_v12 = vpop.f32.mrf.mxu0 }
 0xac8   : > { %v3406_v13 = vpack.c.bf16 %v1342_v11, %v1342_v11 }
 0xac9   : > { %v1344_v14 = vpop.f32.mrf.mxu0 }
 0xaca   : > { %1459 = vrot.lane.b32.xlu0 %v3406_v13, %s2928_s15  ;;  %1349 = vrot.lane.b32.xlu1 %v3406_v13, %s2926_s17  ;;  %s3657_s17 = smov 40   ;;  %s3659_s15 = smov 8  }
 0xacb   : > { %v2461_v61 = vpop.f32.mrf.mxu0 }
 0xace   : > { %1567 = vrot.lane.b32.xlu0 %v3406_v13, %s2930_s30  ;;  %1457 = vrot.lane.b32.xlu1 %v3406_v13, %s2925_s16  ;;  %s3656_s16 = smov 64  }
 0xad2   : > { %1677 = vrot.lane.b32.xlu0 %v3406_v13, %s2931_s12  ;;  %1569 = vrot.lane.b32.xlu1 %v3406_v13, %s2927_s22  ;;  %s3658_s22 = smov 48  }
 0xad6   : > { %1679 = vrot.lane.b32.xlu1 %v3406_v13, %s2929_s27  ;;  %s2939_s27 = smov [#allocation11]  }
 0xad7   : > { %s2838_s21 = sshll.u32 %s2939_s27, 4  ;;  %s2839_s21 = int_to_ptr.vmem [resolvable:$false] %s2838_s21 }
 0xad8   : > { %s2840_s30 = scalar_lea.vmem %s2839_s21, 256  ;;  %p2841_p5 = scmp.lt.s32.totalorder %s2106_s14, %s2839_s21 }
 0xb3c   : > { %v1350_v3 = vpop.permute.xlu1 %1349  ;;  %v1460_v16 = vpop.permute.xlu0 %1459 }
 0xb3d   : > { %v1355_v15 = vsel %vm559_vm2, %v1350_v3, 0  ;;  %v1465_v18 = vsel %vm559_vm2, %v1460_v16, 0 }
 0xb3e   : > { %2463 = vmatpush3.bf16.xpose.msra.mxu0 %v1355_v15 }
 0xb3f   : > { %2474 = vmatprep.subr.bf16.mxu0 %v2923_v0 }
 0xb40   : > { %v1458_v17 = vpop.permute.xlu1 %1457  ;;  %v1568_v23 = vpop.permute.xlu0 %1567 }
 0xb44   : > { %v1570_v19 = vpop.permute.xlu1 %1569  ;;  %v1678_v26 = vpop.permute.xlu0 %1677 }
 0xb45   : > { %2465 = vmatmul.mubr.msk.bf16.vlgmr.msra.gmra.mxu0 %vm559_vm2, %v3406_v13  ;;  %v1575_v21 = vsel %vm559_vm2, %v1570_v19, 0 }
 0xb46   : > { %2475 = vmatpush3.bf16.xpose.msra.mxu0 %v1465_v18  ;;  %2476 = vmatprep.mubr.msk.bf16.mxu0 %vm2924_vm0, %v2923_v0 }
 0xb47   : > { %2486 = vmatprep.subr.bf16.mxu0 %v2923_v0 }
 0xb48   : > { %v1680_v22 = vpop.permute.xlu1 %1679 }
 0xb49   : > { %v1685_v24 = vsel %vm559_vm2, %v1680_v22, 0 }
 0xb4d   : > { %2477 = vmatmul.mubr.msk.bf16.vlgmr.msra.gmra.mxu0 %vm559_vm2, %v1458_v17 }
 0xb4e   : > { %2487 = vmatpush3.bf16.xpose.msra.mxu0 %v1575_v21  ;;  %2488 = vmatprep.mubr.msk.bf16.mxu0 %vm2924_vm0, %v2923_v0 }
 0xb4f   : > { %2498 = vmatprep.subr.bf16.mxu0 %v2923_v0 }
 0xb55   : > { %2489 = vmatmul.mubr.msk.bf16.vlgmr.msra.gmra.mxu0 %vm559_vm2, %v1568_v23 }
 0xb56   : > { %2499 = vmatpush3.bf16.xpose.msra.mxu0 %v1685_v24  ;;  %2500 = vmatprep.mubr.msk.bf16.mxu0 %vm2924_vm0, %v2923_v0 }
 0xb57   : > { %2510 = vmatprep.subr.bf16.mxu0 %v2923_v0 }
 0xb5d   : > { %2501 = vmatmul.mubr.msk.bf16.vlgmr.msra.gmra.mxu0 %vm559_vm2, %v1678_v26 }
 0xb5e   : > { %2514 = vmatprep.mubr.msk.bf16.mxu0 %vm2924_vm0, %v2923_v0 }
 0xc05   : > { %v1391_v27 = vpop.f32.mrf.mxu0 }
 0xc06   : > { %v1392_v28 = vadd.f32 %v1391_v27, %v3264_v25 }
 0xc07   : > { %v2466_v29 = vpop.f32.mrf.mxu0 }
 0xc08   : > { %v1397_v30 = vsel %vm559_vm2, %v1392_v28, -inf }
 0xc09   : > { %1398 = vmax.xlane.f32.xlu1 %v1397_v30  ;;  %v1394_v31 = vpop.f32.mrf.mxu0 }
 0xc0b   : > { %v2467_v32 = vpop.f32.mrf.mxu0 }
 0xc0d   : > { %v1501_v33 = vpop.f32.mrf.mxu0 }
 0xc0e   : > { %v1502_v34 = vadd.f32 %v1501_v33, %v3264_v25 }
 0xc0f   : > { %v2478_v35 = vpop.f32.mrf.mxu0 }
 0xc10   : > { %v1507_v36 = vsel %vm559_vm2, %v1502_v34, -inf }
 0xc11   : > { %1508 = vmax.xlane.f32.xlu0 %v1507_v36  ;;  %v1504_v37 = vpop.f32.mrf.mxu0 }
 0xc13   : > { %v2479_v38 = vpop.f32.mrf.mxu0 }
 0xc15   : > { %v1611_v40 = vpop.f32.mrf.mxu0 }
 0xc16   : > { %v1612_v41 = vadd.f32 %v1611_v40, %v3264_v25 }
 0xc17   : > { %v2490_v42 = vpop.f32.mrf.mxu0 }
 0xc18   : > { %v1617_v43 = vsel %vm559_vm2, %v1612_v41, -inf }
 0xc19   : > { %1618 = vmax.xlane.f32.xlu0 %v1617_v43  ;;  %v1614_v44 = vpop.f32.mrf.mxu0 }
 0xc1b   : > { %v2491_v45 = vpop.f32.mrf.mxu0 }
 0xc1d   : > { %v1721_v46 = vpop.f32.mrf.mxu0 }
 0xc1e   : > { %v1722_v47 = vadd.f32 %v1721_v46, %v3264_v25 }
 0xc1f   : > { %v2502_v48 = vpop.f32.mrf.mxu0 }
 0xc20   : > { %v1727_v49 = vsel %vm559_vm2, %v1722_v47, -inf }
 0xc21   : > { %1728 = vmax.xlane.f32.xlu1 %v1727_v49  ;;  %v1724_v50 = vpop.f32.mrf.mxu0  ;;  %v2650_v49 = vld [vmem:[%s3600_s5 + $0x18] sm:$0xff]  }
 0xc22   : > { %2511 = vmatpush3.bf16.msra.mxu0 %v2650_v49  ;;  %v2651_v50 = vld [vmem:[%s3600_s5 + $0x10] sm:$0xff]  }
 0xc23   : > { %v2503_v51 = vpop.f32.mrf.mxu0  ;;  %2512 = vmatprep.subr.bf16.mxu0 %v2923_v0 }
 0xc26   : > { %2513 = vmatpush3.bf16.msra.mxu0 %v2651_v50 }
 0xc27   : > { %2526 = vmatprep.subr.bf16.mxu0 %v2923_v0 }
 0xc92   : > { %v1399_v52 = vpop.xlane.xlu1 %1398 }
 0xc93   : > { %v1400_v53 = vsub.f32 %v1392_v28, %v1399_v52 }
 0xc95   : > { %v1401_v54 = vmul.f32 1.442695, %v1400_v53 }
 0xc97   : > { %2678 = vpow2.f32 %v1401_v54 }
 0xc9a   : > { %v1509_v55 = vpop.xlane.xlu0 %1508 }
 0xc9b   : > { %v1510_v56 = vsub.f32 %v1502_v34, %v1509_v55 }
 0xc9d   : > { %v1511_v57 = vmul.f32 1.442695, %v1510_v56 }
 0xc9f   : > { %2680 = vpow2.f32 %v1511_v57 }
 0xca2   : > { %v1619_v63 = vpop.xlane.xlu0 %1618 }
 0xca3   : > { %v1620_v1 = vsub.f32 %v1612_v41, %v1619_v63 }
 0xca4   : > { %v2679_v2 = vpop.eup %2678 }
 0xca5   : > { %v1621_v4 = vmul.f32 1.442695, %v1620_v1  ;;  %v1403_v25 = vsel %vm559_vm2, %v2679_v2, 0.0 }
 0xca6   : > { %1404 = vadd.xlane.f32.xlu0 %v1403_v25 }
 0xca7   : > { %2682 = vpow2.f32 %v1621_v4 }
 0xcaa   : > { %v1729_v11 = vpop.xlane.xlu1 %1728 }
 0xcab   : > { %v1730_v12 = vsub.f32 %v1722_v47, %v1729_v11 }
 0xcac   : > { %v2681_v5 = vpop.eup %2680 }
 0xcad   : > { %v1513_v7 = vsel %vm559_vm2, %v2681_v5, 0.0  ;;  %v1731_v14 = vmul.f32 1.442695, %v1730_v12 }
 0xcae   : > { %1514 = vadd.xlane.f32.xlu1 %v1513_v7 }
 0xcaf   : > { %2684 = vpow2.f32 %v1731_v14 }
 0xcb4   : > { %v2683_v8 = vpop.eup %2682 }
 0xcb5   : > { %v1623_v10 = vsel %vm559_vm2, %v2683_v8, 0.0 }
 0xcb6   : > { %1624 = vadd.xlane.f32.xlu0 %v1623_v10  ;;  %v3503_v10 = vld [vmem:[%s3604_s9 + $0x8] sm:$0x3f] }
 0xcb7   : > { %v1811_v11 = vrot.slane %v3503_v10, %v3326_v60 }
 0xcbc   : > { %v2685_v61 = vpop.eup %2684 }
 0xcbd   : > { %v1733_v3 = vsel %vm559_vm2, %v2685_v61, 0.0 }
 0xcbf   : > { %1519 = vrot.lane.b32.xlu1 %v3406_v13, %s2932_s1 }
 0xccc   : > { %1409 = vrot.lane.b32.xlu0 %v3406_v13, %s3656_s16  ;;  %s3663_s16 = sld [smem:[#allocation24_spill]] }
 0xcd0   : > { %1739 = vrot.lane.b32.xlu0 %v3406_v13, %s3657_s17 }
 0xcd2   : > { %s2103_s17 = scalar_lea.hbm %s3663_s16, %s2307_s24 }
 0xce3   : > { %1734 = vadd.xlane.f32.xlu1 %v1733_v3 }
 0xcf4   : > { %1629 = vrot.lane.b32.xlu1 %v3406_v13, %s3658_s22  ;;  %s2092_s22 = scalar_lea.sflag [#allocation4], %s3178_s28 }
 0xd2f   : > { %v1405_v15 = vpop.xlane.xlu0 %1404 }
 0xd30   : > { %2686 = vrcp.f32 %v1405_v15 }
 0xd37   : > { %v1515_v16 = vpop.xlane.xlu1 %1514 }
 0xd38   : > { %2688 = vrcp.f32 %v1515_v16 }
 0xd3b   : > { %v1520_v23 = vpop.permute.xlu1 %1519 }
 0xd3c   : > { %v1525_v27 = vsel %vm623_vm3, %v1520_v23, 0 }
 0xd3d   : > { %v2687_v17 = vpop.eup %2686 }
 0xd3e   : > { %v1407_v19 = vmul.f32 %v2687_v17, %v2679_v2 }
 0xd3f   : > { %v1625_v18 = vpop.xlane.xlu0 %1624 }
 0xd40   : > { %v1408_v24 = vpack.c.bf16 %v1407_v19, %v1407_v19  ;;  %2690 = vrcp.f32 %v1625_v18 }
 0xd43   : > { %v1410_v21 = vpop.permute.xlu0 %1409 }
 0xd44   : > { %v1415_v22 = vsel %vm623_vm3, %v1410_v21, 0 }
 0xd45   : > { %2469 = vmatpush3.bf16.msra.mxu1 %v1415_v22  ;;  %v2689_v26 = vpop.eup %2688 }
 0xd46   : > { %2480 = vmatprep.subr.bf16.mxu1 %v2923_v0  ;;  %v1517_v13 = vmul.f32 %v2689_v26, %v2681_v5  ;;  %v2654_v26 = vld [vmem:[%s3603_s8 + $0x38] sm:$0xff]  }
 0xd47   : > { %v1740_v34 = vpop.permute.xlu0 %1739 }
 0xd48   : > { %2471 = vmatmul.mubr.msk.bf16.vlgmr.msra.gmra.mxu1 %vm559_vm2, %v1408_v24  ;;  %v1518_v28 = vpack.c.bf16 %v1517_v13, %v1517_v13  ;;  %v1745_v36 = vsel %vm623_vm3, %v1740_v34, 0  ;;  %v2652_v24 = vld [vmem:[%s3601_s6 + $0x18] sm:$0xff]  }
 0xd49   : > { %2481 = vmatpush3.bf16.msra.mxu1 %v1525_v27  ;;  %2482 = vmatprep.mubr.msk.bf16.mxu1 %vm2924_vm0, %v2923_v0  ;;  %v2655_v27 = vld [vmem:[%s3603_s8 + $0x30] sm:$0xff]  }
 0xd4a   : > { %2492 = vmatprep.subr.bf16.mxu1 %v2923_v0 }
 0xd4d   : > { %v2691_v29 = vpop.eup %2690 }
 0xd4e   : > { %v1627_v31 = vmul.f32 %v2691_v29, %v2683_v8 }
 0xd50   : > { %2483 = vmatmul.mubr.msk.bf16.vlgmr.msra.gmra.mxu1 %vm559_vm2, %v1518_v28  ;;  %v1628_v35 = vpack.c.bf16 %v1627_v31, %v1627_v31 }
 0xd51   : > { %2494 = vmatprep.mubr.msk.bf16.mxu1 %vm2924_vm0, %v2923_v0 }
 0xd6c   : > { %v1735_v30 = vpop.xlane.xlu1 %1734 }
 0xd6d   : > { %2692 = vrcp.f32 %v1735_v30  ;;  %v1884_v30 = vrot.slane %v3503_v10, %v1095_v9  ;;  %v2657_v9 = vld [vmem:[%s3603_s8 + $0x20] sm:$0xff]  }
 0xd70   : > { %v1630_v32 = vpop.permute.xlu1 %1629 }
 0xd71   : > { %v1635_v33 = vsel %vm623_vm3, %v1630_v32, 0 }
 0xd72   : > { %2493 = vmatpush3.bf16.msra.mxu1 %v1635_v33  ;;  %v1889_v33 = vrot.slane %v3503_v10, %v1100_v20 }
 0xd73   : > { %2504 = vmatprep.subr.bf16.mxu1 %v2923_v0 }
 0xd75   : > { %2495 = vmatmul.mubr.msk.bf16.vlgmr.msra.gmra.mxu1 %vm559_vm2, %v1628_v35 }
 0xd76   : > { %2505 = vmatpush3.bf16.msra.mxu1 %v1745_v36  ;;  %2506 = vmatprep.mubr.msk.bf16.mxu1 %vm2924_vm0, %v2923_v0 }
 0xd77   : > { %2518 = vmatprep.subr.bf16.mxu1 %v2923_v0 }
 0xd7a   : > { %v2693_v37 = vpop.eup %2692 }
 0xd7b   : > { %v1737_v38 = vmul.f32 %v2693_v37, %v2685_v61  ;;  %v2656_v37 = vld [vmem:[%s3603_s8 + $0x28] sm:$0xff]  }
 0xd7d   : > { %v1738_v40 = vpack.c.bf16 %v1737_v38, %v1737_v38  ;;  %v2289_v38 = vld [vmem:[#allocation9 + $0x1] ss:$0 sm:$0xff] }
 0xd7f   : > { %2507 = vmatmul.mubr.msk.bf16.vlgmr.msra.gmra.mxu1 %vm559_vm2, %v1738_v40 }
 0xd80   : > { %2522 = vmatprep.mubr.msk.bf16.mxu1 %vm2924_vm0, %v2923_v0  ;;  %2519 = vmatpush3.bf16.msra.mxu1 %v2652_v24 }
 0xd81   : > { %2520 = vmatprep.subr.bf16.mxu1 %v2923_v0 }
 0xe08   : > { %v1451_v41 = vpop.f32.mrf.mxu1 }
 0xe0a   : > { %v2472_v42 = vpop.f32.mrf.mxu1 }
 0xe0c   : > { %v1454_v43 = vpop.f32.mrf.mxu1 }
 0xe0e   : > { %v2473_v44 = vpop.f32.mrf.mxu1 }
 0xe10   : > { %v1561_v45 = vpop.f32.mrf.mxu1 }
 0xe11   : > { %1788 = vrot.lane.b32.xlu1 %v1561_v45, %s3659_s15  ;;  %s2834_s15 = scalar_lea.vmem %s2106_s14, 128 }
 0xe12   : > { %v2484_v46 = vpop.f32.mrf.mxu1  ;;  %p2835_p9 = scmp.ne.s32.totalorder %s2106_s14, %s2834_s15  ;;  %p2842_p4 = scmp.lt.s32.totalorder %s2840_s30, %s2834_s15 }
 0xe13   : > { %v1974_v46 = vrot.slane %v3503_v10, %v3377_v39 }
 0xe14   : > { %v1564_v47 = vpop.f32.mrf.mxu1  ;;  %p2836_p2 = pnand %p2835_p9, %p3664_p1  ;;  %p2843_p8 = por %p2842_p4, %p2841_p5 }
 0xe16   : > { %v2485_v48 = vpop.f32.mrf.mxu1  ;;  %p2837_p3 = pneg %p2836_p2 }
 0xe18   : > { %p2844_p7 = pnand %p2843_p8, %p2837_p3 }
 0xe35   : > { %v1671_v51 = vpop.f32.mrf.mxu1 }
 0xe36   : > { %1792 = vrot.lane.b32.xlu0 %v1671_v51, %s3660_s29 }
 0xe37   : > { %v2496_v52 = vpop.f32.mrf.mxu1 }
 0xe39   : > { %v1674_v53 = vpop.f32.mrf.mxu1 }
 0xe3b   : > { %v2497_v54 = vpop.f32.mrf.mxu1 }
 0xe3f   : > { %v1781_v55 = vpop.f32.mrf.mxu1 }
 0xe40   : > { %1796 = vrot.lane.b32.xlu1 %v1781_v55, %s3661_s11 }
 0xe41   : > { %v2508_v56 = vpop.f32.mrf.mxu1 }
 0xe43   : > { %v1784_v57 = vpop.f32.mrf.mxu1 }
 0xe45   : > { %v2509_v63 = vpop.f32.mrf.mxu1 }
 0xe83   : > { %v1789_v1 = vpop.permute.xlu1 %1788 }
 0xe84   : > { %v1799_v4 = vsel %vm559_vm2, %v1451_v41, %v1789_v1 }
 0xea8   : > { %v1793_v2 = vpop.permute.xlu0 %1792 }
 0xea9   : > { %v1800_v25 = vsel %vm1010_vm4, %v1799_v4, %v1793_v2  ;;  %v2059_v4 = vrot.slane %v3503_v10, %v1268_v58 }
 0xeb2   : > { %v1797_v5 = vpop.permute.xlu1 %1796 }
 0xeb3   : > { %v1801_v7 = vsel %vm1012_vm5, %v1800_v25, %v1797_v5 }
 0xeb4   : > { %v1802_v8 = vpack.c.bf16 %v1801_v7, %v1801_v7  ;;  %v2064_v7 = vrot.slane %v3503_v10, %v1273_v62  ;;  %v2066_v62 = vld [vmem:[%s3605_s10] sm:$0x3] }
 0xeb5   : > { %v2083_v10 = vrot.slane %v2066_v62, %v3326_v60 }
 0xeb6   : > { %2515 = vmatmul.mubr.msk.bf16.vlgmr.msra.gmra.mxu0 %vm511_vm1, %v1802_v8 }
 0xeb7   : > { %2534 = vmatprep.mubr.msk.bf16.mxu0 %vm2924_vm0, %v2923_v0  ;;  %2527 = vmatpush3.bf16.msra.mxu0 %v2654_v26 }
 0xeb8   : > { %2528 = vmatprep.subr.bf16.mxu0 %v2923_v0 }
 0xebb   : > { %2529 = vmatpush3.bf16.msra.mxu0 %v2655_v27 }
 0xebc   : > { %2530 = vmatprep.subr.bf16.mxu0 %v2923_v0 }
 0xebf   : > { %2531 = vmatpush3.bf16.msra.mxu0 %v2656_v37 }
 0xec0   : > { %2532 = vmatprep.subr.bf16.mxu0 %v2923_v0 }
 0xec3   : > { %2533 = vmatpush3.bf16.msra.mxu0 %v2657_v9 }
 0xf76   : > { %v1861_v12 = vpop.f32.mrf.mxu0 }
 0xf77   : > { %v1862_v14 = vadd.f32 %v1861_v12, %v1811_v11 }
 0xf78   : > { %v2516_v61 = vpop.f32.mrf.mxu0 }
 0xf79   : > { %v1867_v3 = vadd.f32 %v1862_v14, %v3399_v6  ;;  %v2653_v6 = vld [vmem:[%s3601_s6 + $0x10] sm:$0xff]  }
 0xf7a   : > { %v1864_v15 = vpop.f32.mrf.mxu0  ;;  %2521 = vmatpush3.bf16.msra.mxu1 %v2653_v6 }
 0xf7b   : > { %v1868_v16 = vsel %vm511_vm1, %v1867_v3, 0.0 }
 0xf7c   : > { %1869 = vadd.xlane.f32.xlu0 %v1868_v16  ;;  %v2517_v17 = vpop.f32.mrf.mxu0 }
0x1005   : > { %v1870_v18 = vpop.xlane.xlu0 %1869 }
0x1006   : > { %v1871_v19 = vmul.f32 0.03125, %v1870_v18 }
0x1008   : > { %v1872_v21 = vsub.f32 %v1867_v3, %v1871_v19  ;;  %v2088_v19 = vrot.slane %v2066_v62, %v3377_v39 }
0x100a   : > { %v1873_v22 = vmul.f32 %v1872_v21, %v1872_v21 }
0x100c   : > { %v1874_v23 = vsel %vm511_vm1, %v1873_v22, 0.0 }
0x100d   : > { %1875 = vadd.xlane.f32.xlu1 %v1874_v23 }
0x1096   : > { %v1876_v13 = vpop.xlane.xlu1 %1875 }
0x1097   : > { %v1877_v28 = vmul.f32 0.03125, %v1876_v13 }
0x1099   : > { %v1878_v29 = vadd.f32 1e-05, %v1877_v28 }
0x109b   : > { %2694 = vrsqrt.f32 %v1878_v29 }
0x10a8   : > { %v2695_v31 = vpop.eup %2694 }
0x10a9   : > { %v1880_v32 = vmul.f32 %v2695_v31, %v1872_v21 }
0x10ab   : > { %v1885_v34 = vmul.f32 %v1884_v30, %v1880_v32 }
0x10ad   : > { %v1890_v35 = vadd.f32 %v1889_v33, %v1885_v34 }
0x10af   : > { %v1891_v36 = vpack.c.bf16 %v1890_v35, %v1890_v35 }
0x10b1   : > { %2523 = vmatmul.mubr.msk.bf16.vlgmr.msra.gmra.mxu1 %vm511_vm1, %v1891_v36 }
0x1171   : > { %v1954_v40 = vpop.f32.mrf.mxu1 }
0x1172   : > { %v1955_v20 = vadd.f32 %v2289_v38, %v1954_v40 }
0x1173   : > { %v2524_v41 = vpop.f32.mrf.mxu1 }
0x1174   : > { %v1960_v42 = vmax.f32 %v1955_v20, 0.0 }
0x1175   : > { %v1957_v43 = vpop.f32.mrf.mxu1 }
0x1176   : > { %v1961_v44 = vpack.c.bf16 %v1960_v42, %v1960_v42 }
0x1177   : > { %v2525_v45 = vpop.f32.mrf.mxu1 }
0x1178   : > { %2535 = vmatmul.mubr.msk.bf16.vlgmr.msra.gmra.mxu0 %vm1208_vm6, %v1961_v44 }
0x1238   : > { %v2036_v47 = vpop.f32.mrf.mxu0 }
0x1239   : > { %v2037_v0 = vadd.f32 %v2036_v47, %v1974_v46 }
0x123a   : > { %v2536_v48 = vpop.f32.mrf.mxu0 }
0x123b   : > { %v2042_v49 = vadd.f32 %v2037_v0, %v1890_v35 }
0x123c   : > { %v2039_v50 = vpop.f32.mrf.mxu0 }
0x123d   : > { %v2043_v51 = vsel %vm511_vm1, %v2042_v49, 0.0 }
0x123e   : > { %2044 = vadd.xlane.f32.xlu0 %v2043_v51  ;;  %v2537_v52 = vpop.f32.mrf.mxu0 }
0x12c7   : > { %v2045_v53 = vpop.xlane.xlu0 %2044 }
0x12c8   : > { %v2046_v54 = vmul.f32 0.03125, %v2045_v53 }
0x12ca   : > { %v2047_v55 = vsub.f32 %v2042_v49, %v2046_v54 }
0x12cc   : > { %v2048_v56 = vmul.f32 %v2047_v55, %v2047_v55 }
0x12ce   : > { %v2049_v57 = vsel %vm511_vm1, %v2048_v56, 0.0 }
0x12cf   : > { %2050 = vadd.xlane.f32.xlu0 %v2049_v57 }
0x1358   : > { %v2051_v63 = vpop.xlane.xlu0 %2050 }
0x1359   : > { %v2052_v1 = vmul.f32 0.03125, %v2051_v63 }
0x135b   : > { %v2053_v2 = vadd.f32 1e-05, %v2052_v1 }
0x135d   : > { %2696 = vrsqrt.f32 %v2053_v2 }
0x136a   : > { %v2697_v25 = vpop.eup %2696 }
0x136b   : > { %v2055_v5 = vmul.f32 %v2697_v25, %v2047_v55 }
0x136d   : > { %v2060_v8 = vmul.f32 %v2059_v4, %v2055_v5 }
0x136f   : > { %v2065_v11 = vadd.f32 %v2064_v7, %v2060_v8 }
0x1371   : > { %v2067_v12 = vsel %vm511_vm1, %v2065_v11, 0.0 }
0x1372   : > { %2068 = vadd.xlane.f32.xlu1 %v2067_v12 }
0x13fb   : > { %v2069_v14 = vpop.xlane.xlu1 %2068 }
0x13fc   : > { %v2070_v61 = vmul.f32 0.03125, %v2069_v14 }
0x13fe   : > { %v2071_v3 = vsub.f32 %v2065_v11, %v2070_v61 }
0x1400   : > { %v2072_v15 = vmul.f32 %v2071_v3, %v2071_v3 }
0x1402   : > { %v2073_v16 = vsel %vm511_vm1, %v2072_v15, 0.0 }
0x1403   : > { %2074 = vadd.xlane.f32.xlu0 %v2073_v16 }
0x148c   : > { %v2075_v58 = vpop.xlane.xlu0 %2074 }
0x148d   : > { %v2076_v17 = vmul.f32 0.03125, %v2075_v58 }
0x148f   : > { %v2077_v59 = vadd.f32 1e-05, %v2076_v17 }
0x1491   : > { %2698 = vrsqrt.f32 %v2077_v59 }
0x149e   : > { %v2699_v18 = vpop.eup %2698 }
0x149f   : > { %v2079_v21 = vmul.f32 %v2699_v18, %v2071_v3 }
0x14a1   : > { %v2084_v22 = vmul.f32 %v2083_v10, %v2079_v21 }
0x14a3   : > { %v2089_v23 = vadd.f32 %v2088_v19, %v2084_v22 }
0x14a5   : > { %2090 = vst.msk [vmem:[%s474_s25] sm:$0xff] %vm511_vm1, %v2089_v23 }
0x14a6   : > { %2847 = shalt.err (!%p2844_p7)
}
0x14a7   : > { %s2848_s12 = scalar_lea.hbm %s2103_s17, 128  ;;  %s2852_s29 = scalar_lea.hbm %s3663_s16, 256 }
0x14a8   : > { %p2849_p12 = scmp.ne.s32.totalorder %s2103_s17, %s2848_s12  ;;  %p2853_p0 = scmp.lt.s32.totalorder %s2103_s17, %s3663_s16 }
0x14a9   : > { %p2854_p10 = scmp.lt.s32.totalorder %s2852_s29, %s2848_s12 }
0x14aa   : > { %p2850_p11 = pnand %p2849_p12, %p3664_p1 }
0x14ab   : > { %p2855_p6 = por %p2854_p10, %p2853_p0 }
0x14ac   : > { %p2851_p13 = pneg %p2850_p11 }
0x14ae   : > { %p2856_p9 = pnand %p2855_p6, %p2851_p13 }
0x14b0   : > { %2859 = shalt.err (!%p2856_p9)
}
0x14b1   : > { %2554 = dma.vmem_to_hbm [thread:$0]  (%p3664_p1), %s2106_s14, 128, %s2103_s17, %s2092_s22  }
0x14b2 PF: > { %s3665_s23 = sld [smem:[#allocation18_spill]]  ;;  %p3668_p3 = scmp.ge.s32.totalorder %s2914_s20, 2 }
0x14b3   : > { %s3666_s25 = sld [smem:[#allocation19_spill]] }
0x14b8   : > { %s2117_s0 = sand.u32 1, %s3665_s23  }
0x14b9   : > { %p3667_p2 = scmp.ne.s32.totalorder %s3666_s25, 0  ;;  %s2118_s13 = scalar_lea.sflag [#allocation4], %s2117_s0 }
0x14bb   : > { %p2574_p5 = pnand %p3668_p3, %p3667_p2 }
0x14bd   : > { %p2575_p4 = pneg %p2574_p5 }
0x14bf   : > { %2897 = dma.done.wait (%p2575_p4), %s2118_s13, 128  }
0x14c0   : > { %2899 = vsyncadd (%p2575_p4), %s2118_s13, 4294967168  ;;  %s3669_s20 = sld [smem:[#allocation20_spill]]  ;;  %s3671_s17 = smov %s2906_s18 }
0x14c1   : > { %s3670_s15 = sld [smem:[#allocation21_spill]]  ;;  %s3672_s18 = smov %s2910_s19 }
0x14c6   : > { %p26_p8 = scmp.ge.s32.totalorder %s3669_s20, 4  }
0x14c7   : > { %s3673_s19 = smov %s3670_s15 }
0x14c8   :  { %28 = sbr.rel (!%p26_p8) target bundleno = 11 (0xb), region = 139 }
0x14cd   :  { %2123 = vsyncpa [#allocation3], 1 }
0x14ce   :  { %2125 = vsyncpa [#allocation3 + $0x1], 1 }
0x14cf   :  { %2126 = vsyncpa [#allocation6], 1 }
0x14d0   :  { %2127 = vsyncpa [#allocation10], 1 }
0x14d1   :  { %2128 = vsyncpa [#allocation4], 1 }
0x14d2   :  { %2130 = vsyncpa [#allocation4 + $0x1], 1 }

</bundles_post_ra>
